<compile_context>
chip_gen: v7x
topology: tpu7x:2x2x1
jax: 0.10.0
libtpu: 0.0.40
codegen_flags: <defaults>
</compile_context>

<pallas_src>
import functools

import jax
import jax.numpy as jnp
from jax import lax
from jax.experimental import pallas as pl
from jax.experimental.pallas import tpu as pltpu


# --------------------------------------------------------------------------- kernels

def _rms_matmul_kernel(x_ref, g_ref, w_ref, o_ref, *, eps):
    # RMSNorm (over the full feature axis) fused with a matmul against a column tile.
    x = x_ref[...]                                                # (bm, K)
    ms = jnp.mean(x * x, axis=-1, keepdims=True)
    xn = x * lax.rsqrt(ms + eps) * g_ref[...]                     # g: (1, K)
    o_ref[...] = jnp.dot(xn, w_ref[...],
                         preferred_element_type=jnp.float32).astype(o_ref.dtype)


def _conv_silu_kernel(x_ref, w_ref, o_ref, *, ksize):
    # causal depthwise conv1d + SiLU over one (L, C-tile) block.
    # out[t, c] = silu(sum_j w[j, c] * x[t - (K-1) + j, c])
    x = x_ref[...]                                                # (L, C)
    w = w_ref[...]                                                # (K, C)
    row = lax.broadcasted_iota(jnp.int32, x.shape, 0)
    acc = x * w[ksize - 1:ksize, :]                               # tap j=K-1 -> shift 0
    for j in range(ksize - 1):
        s = ksize - 1 - j                                         # shift by s rows
        xs = jnp.where(row >= s, pltpu.roll(x, s, axis=0), 0.0)
        acc = acc + xs * w[j:j + 1, :]
    o_ref[...] = (acc * jax.nn.sigmoid(acc)).astype(o_ref.dtype)


def _swiglu_kernel(y_ref, w1_ref, w2_ref, o_ref):
    y = y_ref[...]
    g = jnp.dot(y, w1_ref[...], preferred_element_type=jnp.float32)
    h = jnp.dot(y, w2_ref[...], preferred_element_type=jnp.float32)
    o_ref[...] = (g * jax.nn.sigmoid(g) * h).astype(o_ref.dtype)   # silu(g) * h


def _matmul_res_kernel(x_ref, w_ref, r_ref, o_ref):
    o_ref[...] = (r_ref[...] +
                  jnp.dot(x_ref[...], w_ref[...],
                          preferred_element_type=jnp.float32)).astype(o_ref.dtype)


def _onorm_oproj_kernel(o_ref, res_ref, seg_ref, segT_ref, g_ref, w_ref, out_ref,
                        *, eps, inv_hd):
    # per-head RMSNorm(head_dim) + o_proj + residual, all lane-dense on (rows, H*D).
    o = o_ref[...]                                                # (bm, H*D)
    ss = jnp.dot(o * o, seg_ref[...],
                 preferred_element_type=jnp.float32) * inv_hd     # (bm, H) mean per head
    scale = jnp.dot(lax.rsqrt(ss + eps), segT_ref[...],
                    preferred_element_type=jnp.float32)           # broadcast back
    on = o * scale * g_ref[...]                                   # g: tiled weight (1, H*D)
    out_ref[...] = (res_ref[...] +
                    jnp.dot(on, w_ref[...],
                            preferred_element_type=jnp.float32)).astype(out_ref.dtype)


def _delta_kernel(q_ref, k_ref, v_ref, beta_ref, seg_ref, segT_ref,
                  o_ref, u_ref, diag_scr, *, chunk_size, n_dbl):
    C = chunk_size
    b = pl.program_id(0)
    n = pl.program_id(1)

    @pl.when(n == 0)
    def _init():
        diag_scr[...] = jnp.zeros_like(diag_scr)

    seg = seg_ref[...]                                            # (H*D, H)
    segT = segT_ref[...]                                          # (H, H*D)

    def head_l2norm(x):
        # x / ||x||_head  computed lane-dense via the segment matrix (no per-head slices)
        ss = jnp.dot(x * x, seg, preferred_element_type=jnp.float32)   # (C, H)
        inv = jnp.where(ss > 0.0, lax.rsqrt(ss), 0.0)                  # guard pad rows
        return x * jnp.dot(inv, segT, preferred_element_type=jnp.float32)

    q = head_l2norm(q_ref[...])                                   # (C, H*D)
    k = head_l2norm(k_ref[...])
    v = v_ref[...]
    beta = jnp.dot(jax.nn.sigmoid(beta_ref[...]), segT,
                   preferred_element_type=jnp.float32)            # (C, H*D) per-head bcast

    k_beta = k * beta
    v_beta = v * beta

    # L = tril(sum_h K_beta_h K_h^T, -1).  The reference row-by-row substitution loop
    # (which re-uses the full current row incl. the diagonal) has the closed form
    #   T = 3*(I - L)^{-1} - 2*I ,  L strictly lower => nilpotent,
    # so (I-L)^{-1} = I + L + L^2 + ... is computed by Neumann doubling (log2(C) steps).
    a_kk = lax.dot_general(k_beta, k, (((1,), (1,)), ((), ())),
                           preferred_element_type=jnp.float32)    # (C, C)
    row_i = lax.broadcasted_iota(jnp.int32, (C, C), 0)
    col_i = lax.broadcasted_iota(jnp.int32, (C, C), 1)
    l_mat = jnp.where(row_i > col_i, -a_kk, 0.0)
    eye = jnp.where(row_i == col_i, 1.0, 0.0)

    inv = eye + l_mat
    p = l_mat
    for _ in range(n_dbl):
        p = jnp.dot(p, p, preferred_element_type=jnp.float32)
        inv = inv + jnp.dot(p, inv, preferred_element_type=jnp.float32)
    t_mat = 3.0 * inv - 2.0 * eye

    w_mat = jnp.dot(t_mat, k_beta, preferred_element_type=jnp.float32)   # (C, H*D)
    u_mat = jnp.dot(t_mat, v_beta, preferred_element_type=jnp.float32)

    s_diag = diag_scr[...]                                        # (1, H*D) = diag(S)
    # einsum('bchd,bhdd->bchd', ., S) == multiply by diag(S)  (reference quirk)
    u = u_mat - w_mat * s_diag
    o_inter = q * s_diag
    a_qk = jnp.sum(q * k, axis=-1, keepdims=True)                 # (C, 1)
    c_iota = lax.broadcasted_iota(jnp.int32, (C, 1), 0)
    a_tril = jnp.where(c_iota <= b, a_qk, 0.0)   # .tril() over the (batch, pos) matrix

    o_ref[...] = (o_inter + a_tril * u).astype(o_ref.dtype)
    u_ref[...] = u.astype(u_ref.dtype)
    # diag(S_new) = diag(S) + sum_c k * u   (diag of per-head K^T U)
    diag_scr[...] = s_diag + jnp.sum(k * u, axis=0, keepdims=True)


def _state_kernel(k_ref, u_ref, s_ref):
    # final memory state for one (batch, head): S = K_norm^T @ U   over all positions.
    k = k_ref[...]                                                # (Lp, D)
    ss = jnp.sum(k * k, axis=-1, keepdims=True)
    kn = k * jnp.where(ss > 0.0, lax.rsqrt(ss), 0.0)
    s_ref[...] = lax.dot_general(kn, u_ref[...], (((0,), (0,)), ((), ())),
                                 preferred_element_type=jnp.float32).astype(s_ref.dtype)


# -------------------------------------------------------------------------- wrappers

def rms_matmul(x, g, w, eps, *, bm=256, bn=512):
    m, kdim = x.shape
    n = w.shape[1]
    bm = min(bm, m)
    bn = min(bn, n)
    return pl.pallas_call(
        functools.partial(_rms_matmul_kernel, eps=eps),
        grid=(pl.cdiv(m, bm), pl.cdiv(n, bn)),
        in_specs=[pl.BlockSpec((bm, kdim), lambda i, j: (i, 0)),
                  pl.BlockSpec((1, kdim), lambda i, j: (0, 0)),
                  pl.BlockSpec((kdim, bn), lambda i, j: (0, j))],
        out_specs=pl.BlockSpec((bm, bn), lambda i, j: (i, j)),
        out_shape=jax.ShapeDtypeStruct((m, n), jnp.float32),
        compiler_params=pltpu.CompilerParams(
            dimension_semantics=("parallel", "parallel")),
    )(x, g.reshape(1, kdim), w)


def causal_conv_silu(x, w, *, bc=1024):
    # x: (B, L, C) channels-last; w: (K, C) depthwise taps (w[j, c] == torch W[c, 0, j]).
    # TODO(synk): for very long L this should also tile L with a (K-1)-row halo.
    b, l, c = x.shape
    ksize = w.shape[0]
    bc = min(bc, c)
    return pl.pallas_call(
        functools.partial(_conv_silu_kernel, ksize=ksize),
        grid=(b, pl.cdiv(c, bc)),
        in_specs=[pl.BlockSpec((None, l, bc), lambda i, j: (i, 0, j)),
                  pl.BlockSpec((ksize, bc), lambda i, j: (0, j))],
        out_specs=pl.BlockSpec((None, l, bc), lambda i, j: (i, 0, j)),
        out_shape=jax.ShapeDtypeStruct((b, l, c), jnp.float32),
        compiler_params=pltpu.CompilerParams(
            dimension_semantics=("parallel", "parallel")),
    )(x, w)


def swiglu(y, w1, w2, *, bm=256, bn=512):
    m, f = y.shape
    n = w1.shape[1]
    bm = min(bm, m)
    bn = min(bn, n)
    return pl.pallas_call(
        _swiglu_kernel,
        grid=(pl.cdiv(m, bm), pl.cdiv(n, bn)),
        in_specs=[pl.BlockSpec((bm, f), lambda i, j: (i, 0)),
                  pl.BlockSpec((f, bn), lambda i, j: (0, j)),
                  pl.BlockSpec((f, bn), lambda i, j: (0, j))],
        out_specs=pl.BlockSpec((bm, bn), lambda i, j: (i, j)),
        out_shape=jax.ShapeDtypeStruct((m, n), jnp.float32),
        compiler_params=pltpu.CompilerParams(
            dimension_semantics=("parallel", "parallel")),
    )(y, w1, w2)


def matmul_residual(x, w, res, *, bm=256):
    m, kdim = x.shape
    n = w.shape[1]
    bm = min(bm, m)
    return pl.pallas_call(
        _matmul_res_kernel,
        grid=(pl.cdiv(m, bm),),
        in_specs=[pl.BlockSpec((bm, kdim), lambda i: (i, 0)),
                  pl.BlockSpec((kdim, n), lambda i: (0, 0)),
                  pl.BlockSpec((bm, n), lambda i: (i, 0))],
        out_specs=pl.BlockSpec((bm, n), lambda i: (i, 0)),
        out_shape=jax.ShapeDtypeStruct((m, n), jnp.float32),
        compiler_params=pltpu.CompilerParams(dimension_semantics=("parallel",)),
    )(x, w, res)


def onorm_oproj_residual(o, res, seg, segT, g_tiled, w, eps, hd, *, bm=256):
    m, dh = o.shape
    h = seg.shape[1]
    bm = min(bm, m)
    return pl.pallas_call(
        functools.partial(_onorm_oproj_kernel, eps=eps, inv_hd=1.0 / hd),
        grid=(pl.cdiv(m, bm),),
        in_specs=[pl.BlockSpec((bm, dh), lambda i: (i, 0)),
                  pl.BlockSpec((bm, dh), lambda i: (i, 0)),
                  pl.BlockSpec((dh, h), lambda i: (0, 0)),
                  pl.BlockSpec((h, dh), lambda i: (0, 0)),
                  pl.BlockSpec((1, dh), lambda i: (0, 0)),
                  pl.BlockSpec((dh, dh), lambda i: (0, 0))],
        out_specs=pl.BlockSpec((bm, dh), lambda i: (i, 0)),
        out_shape=jax.ShapeDtypeStruct((m, dh), jnp.float32),
        compiler_params=pltpu.CompilerParams(dimension_semantics=("parallel",)),
    )(o, res, seg, segT, g_tiled.reshape(1, dh), w)


def chunk_delta_rule(q_c, k_c, v_c, beta_c, seg, segT, chunk_size):
    bsz, n_chunks, c, hd_flat = q_c.shape
    h = beta_c.shape[-1]
    n_dbl = max(0, (chunk_size - 1).bit_length() - 1)   # ceil(log2(C)) - 1
    kernel = functools.partial(_delta_kernel, chunk_size=chunk_size, n_dbl=n_dbl)
    o, u = pl.pallas_call(
        kernel,
        grid=(bsz, n_chunks),
        in_specs=[
            pl.BlockSpec((None, None, c, hd_flat), lambda b, n: (b, n, 0, 0)),
            pl.BlockSpec((None, None, c, hd_flat), lambda b, n: (b, n, 0, 0)),
            pl.BlockSpec((None, None, c, hd_flat), lambda b, n: (b, n, 0, 0)),
            pl.BlockSpec((None, None, c, h), lambda b, n: (b, n, 0, 0)),
            pl.BlockSpec((hd_flat, h), lambda b, n: (0, 0)),
            pl.BlockSpec((h, hd_flat), lambda b, n: (0, 0)),
        ],
        out_specs=[
            pl.BlockSpec((None, None, c, hd_flat), lambda b, n: (b, n, 0, 0)),
            pl.BlockSpec((None, None, c, hd_flat), lambda b, n: (b, n, 0, 0)),
        ],
        out_shape=[
            jax.ShapeDtypeStruct((bsz, n_chunks, c, hd_flat), jnp.float32),
            jax.ShapeDtypeStruct((bsz, n_chunks, c, hd_flat), jnp.float32),
        ],
        scratch_shapes=[pltpu.VMEM((1, hd_flat), jnp.float32)],
        compiler_params=pltpu.CompilerParams(
            dimension_semantics=("parallel", "arbitrary")),
    )(q_c, k_c, v_c, beta_c, seg, segT)
    return o, u


def final_state(k_bhld, u_bhld):
    b, h, lp, d = k_bhld.shape
    return pl.pallas_call(
        _state_kernel,
        grid=(b, h),
        in_specs=[pl.BlockSpec((None, None, lp, d), lambda i, j: (i, j, 0, 0)),
                  pl.BlockSpec((None, None, lp, d), lambda i, j: (i, j, 0, 0))],
        out_specs=pl.BlockSpec((None, None, d, d), lambda i, j: (i, j, 0, 0)),
        out_shape=jax.ShapeDtypeStruct((b, h, d, d), jnp.float32),
        compiler_params=pltpu.CompilerParams(
            dimension_semantics=("parallel", "parallel")),
    )(k_bhld, u_bhld)


# ---------------------------------------------------------------------- full forward

def deltanet_block_forward(params, x, cfg):
    eps = cfg["norm_eps"]
    H = cfg["num_heads"]
    Dh = cfg["hidden_size"]
    hd = Dh // H
    Cs = cfg["chunk_size"]
    B, L, _ = x.shape
    M = B * L
    x2 = x.reshape(M, Dh)

    # per-head segment matrix (Dh, H): seg[f, h] = 1 if f belongs to head h
    seg = jnp.repeat(jnp.eye(H, dtype=jnp.float32), hd, axis=0)
    segT = seg.T

    # ---- attention branch ----
    # fused attn_norm + [q|k|v|b] projection (x read once)
    w_qkvb = jnp.concatenate(
        [params["q_w"], params["k_w"], params["v_w"], params["b_w"]], axis=1)
    qkvb = rms_matmul(x2, params["attn_norm_w"], w_qkvb, eps)          # (M, 3Dh+H)
    qkv = qkvb[:, :3 * Dh].reshape(B, L, 3 * Dh)
    b_logits = qkvb[:, 3 * Dh:]                                        # (M, H)

    # fused depthwise causal conv + SiLU over the concatenated q|k|v channels
    w_conv = jnp.concatenate(
        [params["q_conv_w"], params["k_conv_w"], params["v_conv_w"]], axis=1)
    qkv = causal_conv_silu(qkv, w_conv)                                # (B, L, 3Dh)
    q = qkv[..., :Dh]
    k = qkv[..., Dh:2 * Dh]
    v = qkv[..., 2 * Dh:]

    # chunk the sequence (zero-pad tail to a multiple of chunk_size, as in reference)
    N = -(-L // Cs)
    Lp = N * Cs
    pad = Lp - L
    bl = b_logits.reshape(B, L, H)
    if pad:
        pw = ((0, 0), (0, pad), (0, 0))
        q, k, v, bl = (jnp.pad(a, pw) for a in (q, k, v, bl))
    q_c = q.reshape(B, N, Cs, Dh)
    k_c = k.reshape(B, N, Cs, Dh)
    v_c = v.reshape(B, N, Cs, Dh)
    b_c = bl.reshape(B, N, Cs, H)

    # sequential chunked delta rule (per-head L2 norm of q/k + sigmoid(beta) fused in)
    o, u = chunk_delta_rule(q_c, k_c, v_c, b_c, seg, segT, Cs)

    # final memory state: S[b, h] = sum_t k_norm[b, t, h, :]^T u[b, t, h, :]
    k_bhld = k.reshape(B, Lp, H, hd).transpose(0, 2, 1, 3)
    u_bhld = u.reshape(B, Lp, H, hd).transpose(0, 2, 1, 3)
    memory_state = final_state(k_bhld, u_bhld)                         # (B, H, hd, hd)

    o = o.reshape(B, Lp, Dh)[:, :L].reshape(M, Dh)

    # fused per-head RMSNorm(head_dim) + o_proj + residual
    h1 = onorm_oproj_residual(o, x2, seg, segT,
                              jnp.tile(params["o_norm_w"], H), params["o_w"], eps, hd)

    # ---- MLP branch ----
    y = rms_matmul(h1, params["mlp_norm_w"], params["up_w"], eps)      # (M, inter)
    g = swiglu(y, params["sw_w1"], params["sw_w2"])                    # (M, inter)
    out = matmul_residual(g, params["down_w"], h1)                     # (M, Dh)
    return out.reshape(B, L, Dh), memory_state


# ---------------------------------------------------------------------------- params

def init_params(key, cfg):
    Dh = cfg["hidden_size"]
    H = cfg["num_heads"]
    hd = Dh // H
    K = cfg["conv_size"]
    inter = int(Dh * 4 * 2 / 3)
    inter = 256 * ((inter + 255) // 256)
    ks = jax.random.split(key, 12)
    s = 0.08
    nrm = lambda kk, shp: (s * jax.random.normal(kk, shp, jnp.float32))
    return {
        "attn_norm_w": jnp.ones((Dh,), jnp.float32),
        "q_w": nrm(ks[0], (Dh, Dh)),
        "k_w": nrm(ks[1], (Dh, Dh)),
        "v_w": nrm(ks[2], (Dh, Dh)),
        "b_w": nrm(ks[3], (Dh, H)),
        "q_conv_w": nrm(ks[4], (K, Dh)),
        "k_conv_w": nrm(ks[5], (K, Dh)),
        "v_conv_w": nrm(ks[6], (K, Dh)),
        "o_norm_w": jnp.ones((hd,), jnp.float32),
        "o_w": nrm(ks[7], (Dh, Dh)),
        "mlp_norm_w": jnp.ones((Dh,), jnp.float32),
        "up_w": nrm(ks[8], (Dh, inter)),
        "sw_w1": nrm(ks[9], (inter, inter)),
        "sw_w2": nrm(ks[10], (inter, inter)),
        "down_w": nrm(ks[11], (inter, Dh)),
    }


if __name__ == "__main__":
    cfg = dict(hidden_size=32, num_heads=4, conv_size=4, chunk_size=8, norm_eps=1e-6)
    B, L = 2, 16

    kp, kx = jax.random.split(jax.random.PRNGKey(0))
    params = init_params(kp, cfg)
    x = jax.random.normal(kx, (B, L, cfg["hidden_size"]), jnp.float32)

    fwd = jax.jit(functools.partial(deltanet_block_forward, cfg=cfg))
    y, state = fwd(params, x)
    y, state = jax.block_until_ready((y, state))

    assert y.shape == (B, L, cfg["hidden_size"])
    hd = cfg["hidden_size"] // cfg["num_heads"]
    assert state.shape == (B, cfg["num_heads"], hd, hd)
    assert bool(jnp.all(jnp.isfinite(y))) and bool(jnp.all(jnp.isfinite(state)))
    print("KERNEL_OK")
</pallas_src>

<mosaic_0001>
module attributes {stable_mosaic.version = 11 : i64} {
  func.func @_rms_matmul_kernel(%arg0: i32, %arg1: i32, %arg2: memref<32x32xf32, #tpu.memory_space<vmem>>, %arg3: memref<1x32xf32, #tpu.memory_space<vmem>>, %arg4: memref<32x100xf32, #tpu.memory_space<vmem>>, %arg5: memref<32x100xf32, #tpu.memory_space<vmem>>) attributes {dimension_semantics = [#tpu.dimension_semantics<parallel>, #tpu.dimension_semantics<parallel>], iteration_bounds = array<i64: 1, 1>, scalar_prefetch = 0 : i64, scratch_operands = 0 : i64, tpu.core_type = #tpu.core_type<tc>, window_params = [{transform_indices = @transform_0, window_bounds = array<i64: 32, 32>}, {pipeline_mode = #tpu.pipeline_mode<synchronous>, transform_indices = @transform_1, window_bounds = array<i64: 1, 32>}, {transform_indices = @transform_2, window_bounds = array<i64: 32, 100>}, {transform_indices = @transform_3, window_bounds = array<i64: 32, 100>}]} {
    %c0 = arith.constant 0 : index
    %c0_0 = arith.constant 0 : index
    %0 = vector.load %arg2[%c0, %c0_0] : memref<32x32xf32, #tpu.memory_space<vmem>>, vector<32x32xf32>
    %1 = arith.mulf %0, %0 : vector<32x32xf32>
    %cst = arith.constant dense<0.000000e+00> : vector<32xf32>
    %2 = vector.multi_reduction <add>, %1, %cst [1] : vector<32x32xf32> to vector<32xf32>
    %3 = vector.shape_cast %2 : vector<32xf32> to vector<32x1xf32>
    %cst_1 = arith.constant 3.200000e+01 : f32
    %4 = vector.broadcast %cst_1 : f32 to vector<32x1xf32>
    %5 = arith.divf %3, %4 : vector<32x1xf32>
    %cst_2 = arith.constant 9.99999997E-7 : f32
    %6 = vector.broadcast %cst_2 : f32 to vector<32x1xf32>
    %7 = arith.addf %5, %6 : vector<32x1xf32>
    %8 = math.rsqrt %7 : vector<32x1xf32>
    %9 = vector.broadcast %8 : vector<32x1xf32> to vector<32x32xf32>
    %10 = arith.mulf %0, %9 : vector<32x32xf32>
    %c0_3 = arith.constant 0 : index
    %c0_4 = arith.constant 0 : index
    %11 = vector.load %arg3[%c0_3, %c0_4] : memref<1x32xf32, #tpu.memory_space<vmem>>, vector<1x32xf32>
    %12 = vector.broadcast %11 : vector<1x32xf32> to vector<32x32xf32>
    %13 = arith.mulf %10, %12 : vector<32x32xf32>
    %c0_5 = arith.constant 0 : index
    %c0_6 = arith.constant 0 : index
    %14 = vector.load %arg4[%c0_5, %c0_6] : memref<32x100xf32, #tpu.memory_space<vmem>>, vector<32x100xf32>
    %cst_7 = arith.constant dense<0.000000e+00> : vector<32x100xf32>
    %15 = tpu.matmul %13, %14, %cst_7 {dimension_numbers = #tpu.dot_dimension_numbers<[1], [0], [0], [1], [0, 0, 1, 1], [], []>} : vector<32x32xf32>, vector<32x100xf32>, vector<32x100xf32> -> vector<32x100xf32>
    %c0_8 = arith.constant 0 : index
    %c0_9 = arith.constant 0 : index
    %16 = vector.load %arg5[%c0_8, %c0_9] : memref<32x100xf32, #tpu.memory_space<vmem>>, vector<32x100xf32>
    tpu.vector_store %arg5[%c0_8, %c0_9], %15 {strides = array<i32>} : memref<32x100xf32, #tpu.memory_space<vmem>>, vector<32x100xf32>,
    return
  }
  func.func @transform_0(%arg0: i32, %arg1: i32) -> (i32, i32) {
    %c0_i32 = arith.constant 0 : i32
    %c0_i32_0 = arith.constant 0 : i32
    return %arg0, %c0_i32 : i32, i32
  }
  func.func @transform_1(%arg0: i32, %arg1: i32) -> (i32, i32) {
    %c0_i32 = arith.constant 0 : i32
    %c0_i32_0 = arith.constant 0 : i32
    %c0_i32_1 = arith.constant 0 : i32
    return %c0_i32, %c0_i32_0 : i32, i32
  }
  func.func @transform_2(%arg0: i32, %arg1: i32) -> (i32, i32) {
    %c0_i32 = arith.constant 0 : i32
    %c0_i32_0 = arith.constant 0 : i32
    return %c0_i32, %arg1 : i32, i32
  }
  func.func @transform_3(%arg0: i32, %arg1: i32) -> (i32, i32) {
    %c0_i32 = arith.constant 0 : i32
    return %arg0, %arg1 : i32, i32
  }
}

module attributes {stable_mosaic.version = 11 : i64} {
  func.func @_conv_silu_kernel(%arg0: i32, %arg1: i32, %arg2: memref<1x16x96xf32, #tpu.memory_space<vmem>>, %arg3: memref<4x96xf32, #tpu.memory_space<vmem>>, %arg4: memref<1x16x96xf32, #tpu.memory_space<vmem>>) attributes {dimension_semantics = [#tpu.dimension_semantics<parallel>, #tpu.dimension_semantics<parallel>], iteration_bounds = array<i64: 2, 1>, scalar_prefetch = 0 : i64, scratch_operands = 0 : i64, tpu.core_type = #tpu.core_type<tc>, window_params = [{transform_indices = @transform_0, window_bounds = array<i64: 1, 16, 96>}, {transform_indices = @transform_1, window_bounds = array<i64: 4, 96>}, {transform_indices = @transform_2, window_bounds = array<i64: 1, 16, 96>}]} {
    %c0 = arith.constant 0 : index
    %c0_0 = arith.constant 0 : index
    %c0_1 = arith.constant 0 : index
    %0 = vector.load %arg2[%c0, %c0_0, %c0_1] : memref<1x16x96xf32, #tpu.memory_space<vmem>>, vector<1x16x96xf32>
    %1 = vector.shape_cast %0 : vector<1x16x96xf32> to vector<16x96xf32>
    %c0_2 = arith.constant 0 : index
    %c0_3 = arith.constant 0 : index
    %2 = vector.load %arg3[%c0_2, %c0_3] : memref<4x96xf32, #tpu.memory_space<vmem>>, vector<4x96xf32>
    %3 = tpu.iota {dimensions = array<i32: 0>} : vector<16x96xi32>
    %4 = vector.extract_strided_slice %2 {offsets = [3, 0], sizes = [1, 96], strides = [1, 1]} : vector<4x96xf32> to vector<1x96xf32>
    %5 = vector.broadcast %4 : vector<1x96xf32> to vector<16x96xf32>
    %6 = arith.mulf %1, %5 : vector<16x96xf32>
    %c3_i32 = arith.constant 3 : i32
    %7 = vector.broadcast %c3_i32 : i32 to vector<16x96xi32>
    %8 = arith.cmpi sge, %3, %7 : vector<16x96xi32>
    %c3_i32_4 = arith.constant 3 : i32
    %9 = tpu.dynamic_rotate %1 by %c3_i32_4 dim 0 : vector<16x96xf32>, i32 -> vector<16x96xf32>
    %cst = arith.constant 0.000000e+00 : f32
    %10 = vector.broadcast %cst : f32 to vector<16x96xf32>
    %11 = arith.select %8, %9, %10 : vector<16x96xi1>, vector<16x96xf32>
    %12 = vector.extract_strided_slice %2 {offsets = [0, 0], sizes = [1, 96], strides = [1, 1]} : vector<4x96xf32> to vector<1x96xf32>
    %13 = vector.broadcast %12 : vector<1x96xf32> to vector<16x96xf32>
    %14 = arith.mulf %11, %13 : vector<16x96xf32>
    %15 = arith.addf %6, %14 : vector<16x96xf32>
    %c2_i32 = arith.constant 2 : i32
    %16 = vector.broadcast %c2_i32 : i32 to vector<16x96xi32>
    %17 = arith.cmpi sge, %3, %16 : vector<16x96xi32>
    %c2_i32_5 = arith.constant 2 : i32
    %18 = tpu.dynamic_rotate %1 by %c2_i32_5 dim 0 : vector<16x96xf32>, i32 -> vector<16x96xf32>
    %cst_6 = arith.constant 0.000000e+00 : f32
    %19 = vector.broadcast %cst_6 : f32 to vector<16x96xf32>
    %20 = arith.select %17, %18, %19 : vector<16x96xi1>, vector<16x96xf32>
    %21 = vector.extract_strided_slice %2 {offsets = [1, 0], sizes = [1, 96], strides = [1, 1]} : vector<4x96xf32> to vector<1x96xf32>
    %22 = vector.broadcast %21 : vector<1x96xf32> to vector<16x96xf32>
    %23 = arith.mulf %20, %22 : vector<16x96xf32>
    %24 = arith.addf %15, %23 : vector<16x96xf32>
    %c1_i32 = arith.constant 1 : i32
    %25 = vector.broadcast %c1_i32 : i32 to vector<16x96xi32>
    %26 = arith.cmpi sge, %3, %25 : vector<16x96xi32>
    %c1_i32_7 = arith.constant 1 : i32
    %27 = tpu.dynamic_rotate %1 by %c1_i32_7 dim 0 : vector<16x96xf32>, i32 -> vector<16x96xf32>
    %cst_8 = arith.constant 0.000000e+00 : f32
    %28 = vector.broadcast %cst_8 : f32 to vector<16x96xf32>
    %29 = arith.select %26, %27, %28 : vector<16x96xi1>, vector<16x96xf32>
    %30 = vector.extract_strided_slice %2 {offsets = [2, 0], sizes = [1, 96], strides = [1, 1]} : vector<4x96xf32> to vector<1x96xf32>
    %31 = vector.broadcast %30 : vector<1x96xf32> to vector<16x96xf32>
    %32 = arith.mulf %29, %31 : vector<16x96xf32>
    %33 = arith.addf %24, %32 : vector<16x96xf32>
    %34 = arith.negf %33 : vector<16x96xf32>
    %35 = math.exp %34 : vector<16x96xf32>
    %cst_9 = arith.constant 1.000000e+00 : f32
    %36 = vector.broadcast %cst_9 : f32 to vector<16x96xf32>
    %37 = arith.addf %36, %35 : vector<16x96xf32>
    %38 = arith.divf %36, %37 : vector<16x96xf32>
    %39 = arith.mulf %33, %38 : vector<16x96xf32>
    %c0_10 = arith.constant 0 : index
    %c0_11 = arith.constant 0 : index
    %c0_12 = arith.constant 0 : index
    %40 = vector.load %arg4[%c0_10, %c0_11, %c0_12] : memref<1x16x96xf32, #tpu.memory_space<vmem>>, vector<1x16x96xf32>
    %41 = vector.shape_cast %40 : vector<1x16x96xf32> to vector<16x96xf32>
    %42 = vector.shape_cast %39 : vector<16x96xf32> to vector<1x16x96xf32>
    tpu.vector_store %arg4[%c0_10, %c0_11, %c0_12], %42 {strides = array<i32>} : memref<1x16x96xf32, #tpu.memory_space<vmem>>, vector<1x16x96xf32>,
    return
  }
  func.func @transform_0(%arg0: i32, %arg1: i32) -> (i32, i32, i32) {
    %c0_i32 = arith.constant 0 : i32
    %c0_i32_0 = arith.constant 0 : i32
    return %arg0, %c0_i32, %arg1 : i32, i32, i32
  }
  func.func @transform_1(%arg0: i32, %arg1: i32) -> (i32, i32) {
    %c0_i32 = arith.constant 0 : i32
    %c0_i32_0 = arith.constant 0 : i32
    return %c0_i32, %arg1 : i32, i32
  }
  func.func @transform_2(%arg0: i32, %arg1: i32) -> (i32, i32, i32) {
    %c0_i32 = arith.constant 0 : i32
    %c0_i32_0 = arith.constant 0 : i32
    return %arg0, %c0_i32, %arg1 : i32, i32, i32
  }
}

module attributes {stable_mosaic.version = 11 : i64} {
  func.func @_delta_kernel(%arg0: i32, %arg1: i32, %arg2: memref<1x1x8x32xf32, #tpu.memory_space<vmem>>, %arg3: memref<1x1x8x32xf32, #tpu.memory_space<vmem>>, %arg4: memref<1x1x8x32xf32, #tpu.memory_space<vmem>>, %arg5: memref<1x1x8x4xf32, #tpu.memory_space<vmem>>, %arg6: memref<32x4xf32, #tpu.memory_space<vmem>>, %arg7: memref<4x32xf32, #tpu.memory_space<vmem>>, %arg8: memref<1x1x8x32xf32, #tpu.memory_space<vmem>>, %arg9: memref<1x1x8x32xf32, #tpu.memory_space<vmem>>, %arg10: memref<1x32xf32, #tpu.memory_space<vmem>>) attributes {dimension_semantics = [#tpu.dimension_semantics<parallel>, #tpu.dimension_semantics<arbitrary>], iteration_bounds = array<i64: 2, 2>, scalar_prefetch = 0 : i64, scratch_operands = 1 : i64, tpu.core_type = #tpu.core_type<tc>, window_params = [{transform_indices = @transform_0, window_bounds = array<i64: 1, 1, 8, 32>}, {transform_indices = @transform_1, window_bounds = array<i64: 1, 1, 8, 32>}, {transform_indices = @transform_2, window_bounds = array<i64: 1, 1, 8, 32>}, {transform_indices = @transform_3, window_bounds = array<i64: 1, 1, 8, 4>}, {pipeline_mode = #tpu.pipeline_mode<synchronous>, transform_indices = @transform_4, window_bounds = array<i64: 32, 4>}, {pipeline_mode = #tpu.pipeline_mode<synchronous>, transform_indices = @transform_5, window_bounds = array<i64: 4, 32>}, {transform_indices = @transform_6, window_bounds = array<i64: 1, 1, 8, 32>}, {transform_indices = @transform_7, window_bounds = array<i64: 1, 1, 8, 32>}]} {
    %c0_i32 = arith.constant 0 : i32
    %0 = arith.cmpi eq, %arg1, %c0_i32 : i32
    %1 = arith.extui %0 : i1 to i32
    %c0_i32_0 = arith.constant 0 : i32
    %2 = arith.cmpi ne, %1, %c0_i32_0 : i32
    scf.if %2 {
      %cst_57 = arith.constant 0.000000e+00 : f32
      %93 = vector.broadcast %cst_57 : f32 to vector<1x32xf32>
      %c0_58 = arith.constant 0 : index
      %c0_59 = arith.constant 0 : index
      %94 = vector.load %arg10[%c0_58, %c0_59] : memref<1x32xf32, #tpu.memory_space<vmem>>, vector<1x32xf32>
      tpu.vector_store %arg10[%c0_58, %c0_59], %93 {strides = array<i32>} : memref<1x32xf32, #tpu.memory_space<vmem>>, vector<1x32xf32>,
    } else {
    }
    %c0 = arith.constant 0 : index
    %c0_1 = arith.constant 0 : index
    %3 = vector.load %arg6[%c0, %c0_1] : memref<32x4xf32, #tpu.memory_space<vmem>>, vector<32x4xf32>
    %c0_2 = arith.constant 0 : index
    %c0_3 = arith.constant 0 : index
    %4 = vector.load %arg7[%c0_2, %c0_3] : memref<4x32xf32, #tpu.memory_space<vmem>>, vector<4x32xf32>
    %c0_4 = arith.constant 0 : index
    %c0_5 = arith.constant 0 : index
    %c0_6 = arith.constant 0 : index
    %c0_7 = arith.constant 0 : index
    %5 = vector.load %arg2[%c0_4, %c0_5, %c0_6, %c0_7] : memref<1x1x8x32xf32, #tpu.memory_space<vmem>>, vector<1x1x8x32xf32>
    %6 = vector.shape_cast %5 : vector<1x1x8x32xf32> to vector<8x32xf32>
    %7 = arith.mulf %6, %6 : vector<8x32xf32>
    %cst = arith.constant dense<0.000000e+00> : vector<8x4xf32>
    %8 = tpu.matmul %7, %3, %cst {dimension_numbers = #tpu.dot_dimension_numbers<[1], [0], [0], [1], [0, 0, 1, 1], [], []>} : vector<8x32xf32>, vector<32x4xf32>, vector<8x4xf32> -> vector<8x4xf32>
    %cst_8 = arith.constant 0.000000e+00 : f32
    %9 = vector.broadcast %cst_8 : f32 to vector<8x4xf32>
    %10 = arith.cmpf ogt, %8, %9 : vector<8x4xf32>
    %11 = math.rsqrt %8 : vector<8x4xf32>
    %cst_9 = arith.constant 0.000000e+00 : f32
    %12 = vector.broadcast %cst_9 : f32 to vector<8x4xf32>
    %13 = arith.select %10, %11, %12 : vector<8x4xi1>, vector<8x4xf32>
    %cst_10 = arith.constant dense<0.000000e+00> : vector<8x32xf32>
    %14 = tpu.matmul %13, %4, %cst_10 {dimension_numbers = #tpu.dot_dimension_numbers<[1], [0], [0], [1], [0, 0, 1, 1], [], []>} : vector<8x4xf32>, vector<4x32xf32>, vector<8x32xf32> -> vector<8x32xf32>
    %15 = arith.mulf %6, %14 : vector<8x32xf32>
    %c0_11 = arith.constant 0 : index
    %c0_12 = arith.constant 0 : index
    %c0_13 = arith.constant 0 : index
    %c0_14 = arith.constant 0 : index
    %16 = vector.load %arg3[%c0_11, %c0_12, %c0_13, %c0_14] : memref<1x1x8x32xf32, #tpu.memory_space<vmem>>, vector<1x1x8x32xf32>
    %17 = vector.shape_cast %16 : vector<1x1x8x32xf32> to vector<8x32xf32>
    %18 = arith.mulf %17, %17 : vector<8x32xf32>
    %cst_15 = arith.constant dense<0.000000e+00> : vector<8x4xf32>
    %19 = tpu.matmul %18, %3, %cst_15 {dimension_numbers = #tpu.dot_dimension_numbers<[1], [0], [0], [1], [0, 0, 1, 1], [], []>} : vector<8x32xf32>, vector<32x4xf32>, vector<8x4xf32> -> vector<8x4xf32>
    %cst_16 = arith.constant 0.000000e+00 : f32
    %20 = vector.broadcast %cst_16 : f32 to vector<8x4xf32>
    %21 = arith.cmpf ogt, %19, %20 : vector<8x4xf32>
    %22 = math.rsqrt %19 : vector<8x4xf32>
    %cst_17 = arith.constant 0.000000e+00 : f32
    %23 = vector.broadcast %cst_17 : f32 to vector<8x4xf32>
    %24 = arith.select %21, %22, %23 : vector<8x4xi1>, vector<8x4xf32>
    %cst_18 = arith.constant dense<0.000000e+00> : vector<8x32xf32>
    %25 = tpu.matmul %24, %4, %cst_18 {dimension_numbers = #tpu.dot_dimension_numbers<[1], [0], [0], [1], [0, 0, 1, 1], [], []>} : vector<8x4xf32>, vector<4x32xf32>, vector<8x32xf32> -> vector<8x32xf32>
    %26 = arith.mulf %17, %25 : vector<8x32xf32>
    %c0_19 = arith.constant 0 : index
    %c0_20 = arith.constant 0 : index
    %c0_21 = arith.constant 0 : index
    %c0_22 = arith.constant 0 : index
    %27 = vector.load %arg4[%c0_19, %c0_20, %c0_21, %c0_22] : memref<1x1x8x32xf32, #tpu.memory_space<vmem>>, vector<1x1x8x32xf32>
    %28 = vector.shape_cast %27 : vector<1x1x8x32xf32> to vector<8x32xf32>
    %c0_23 = arith.constant 0 : index
    %c0_24 = arith.constant 0 : index
    %c0_25 = arith.constant 0 : index
    %c0_26 = arith.constant 0 : index
    %29 = vector.load %arg5[%c0_23, %c0_24, %c0_25, %c0_26] : memref<1x1x8x4xf32, #tpu.memory_space<vmem>>, vector<1x1x8x4xf32>
    %30 = vector.shape_cast %29 : vector<1x1x8x4xf32> to vector<8x4xf32>
    %31 = arith.negf %30 : vector<8x4xf32>
    %32 = math.exp %31 : vector<8x4xf32>
    %cst_27 = arith.constant 1.000000e+00 : f32
    %33 = vector.broadcast %cst_27 : f32 to vector<8x4xf32>
    %34 = arith.addf %33, %32 : vector<8x4xf32>
    %35 = arith.divf %33, %34 : vector<8x4xf32>
    %cst_28 = arith.constant dense<0.000000e+00> : vector<8x32xf32>
    %36 = tpu.matmul %35, %4, %cst_28 {dimension_numbers = #tpu.dot_dimension_numbers<[1], [0], [0], [1], [0, 0, 1, 1], [], []>} : vector<8x4xf32>, vector<4x32xf32>, vector<8x32xf32> -> vector<8x32xf32>
    %37 = arith.mulf %26, %36 : vector<8x32xf32>
    %38 = arith.mulf %28, %36 : vector<8x32xf32>
    %cst_29 = arith.constant dense<0.000000e+00> : vector<8x8xf32>
    %39 = tpu.matmul %37, %26, %cst_29 {dimension_numbers = #tpu.dot_dimension_numbers<[1], [1], [0], [0], [0, 0, 1, 0], [], []>} : vector<8x32xf32>, vector<8x32xf32>, vector<8x8xf32> -> vector<8x8xf32>
    %40 = tpu.iota {dimensions = array<i32: 0>} : vector<8x8xi32>
    %41 = tpu.iota {dimensions = array<i32: 1>} : vector<8x8xi32>
    %42 = arith.cmpi sgt, %40, %41 : vector<8x8xi32>
    %cst_30 = arith.constant 0.000000e+00 : f32
    %43 = vector.broadcast %cst_30 : f32 to vector<8x8xf32>
    %44 = arith.subf %43, %39 : vector<8x8xf32>
    %cst_31 = arith.constant 0.000000e+00 : f32
    %45 = vector.broadcast %cst_31 : f32 to vector<8x8xf32>
    %46 = arith.select %42, %44, %45 : vector<8x8xi1>, vector<8x8xf32>
    %47 = arith.cmpi eq, %40, %41 : vector<8x8xi32>
    %cst_32 = arith.constant 1.000000e+00 : f32
    %cst_33 = arith.constant 0.000000e+00 : f32
    %48 = vector.broadcast %cst_32 : f32 to vector<8x8xf32>
    %49 = vector.broadcast %cst_33 : f32 to vector<8x8xf32>
    %50 = arith.select %47, %48, %49 : vector<8x8xi1>, vector<8x8xf32>
    %51 = arith.addf %50, %46 : vector<8x8xf32>
    %cst_34 = arith.constant dense<0.000000e+00> : vector<8x8xf32>
    %52 = tpu.matmul %46, %46, %cst_34 {dimension_numbers = #tpu.dot_dimension_numbers<[1], [0], [0], [1], [0, 0, 1, 1], [], []>} : vector<8x8xf32>, vector<8x8xf32>, vector<8x8xf32> -> vector<8x8xf32>
    %cst_35 = arith.constant dense<0.000000e+00> : vector<8x8xf32>
    %53 = tpu.matmul %52, %51, %cst_35 {dimension_numbers = #tpu.dot_dimension_numbers<[1], [0], [0], [1], [0, 0, 1, 1], [], []>} : vector<8x8xf32>, vector<8x8xf32>, vector<8x8xf32> -> vector<8x8xf32>
    %54 = arith.addf %51, %53 : vector<8x8xf32>
    %cst_36 = arith.constant dense<0.000000e+00> : vector<8x8xf32>
    %55 = tpu.matmul %52, %52, %cst_36 {dimension_numbers = #tpu.dot_dimension_numbers<[1], [0], [0], [1], [0, 0, 1, 1], [], []>} : vector<8x8xf32>, vector<8x8xf32>, vector<8x8xf32> -> vector<8x8xf32>
    %cst_37 = arith.constant dense<0.000000e+00> : vector<8x8xf32>
    %56 = tpu.matmul %55, %54, %cst_37 {dimension_numbers = #tpu.dot_dimension_numbers<[1], [0], [0], [1], [0, 0, 1, 1], [], []>} : vector<8x8xf32>, vector<8x8xf32>, vector<8x8xf32> -> vector<8x8xf32>
    %57 = arith.addf %54, %56 : vector<8x8xf32>
    %cst_38 = arith.constant 3.000000e+00 : f32
    %58 = vector.broadcast %cst_38 : f32 to vector<8x8xf32>
    %59 = arith.mulf %58, %57 : vector<8x8xf32>
    %cst_39 = arith.constant 2.000000e+00 : f32
    %60 = vector.broadcast %cst_39 : f32 to vector<8x8xf32>
    %61 = arith.mulf %60, %50 : vector<8x8xf32>
    %62 = arith.subf %59, %61 : vector<8x8xf32>
    %cst_40 = arith.constant dense<0.000000e+00> : vector<8x32xf32>
    %63 = tpu.matmul %62, %37, %cst_40 {dimension_numbers = #tpu.dot_dimension_numbers<[1], [0], [0], [1], [0, 0, 1, 1], [], []>} : vector<8x8xf32>, vector<8x32xf32>, vector<8x32xf32> -> vector<8x32xf32>
    %cst_41 = arith.constant dense<0.000000e+00> : vector<8x32xf32>
    %64 = tpu.matmul %62, %38, %cst_41 {dimension_numbers = #tpu.dot_dimension_numbers<[1], [0], [0], [1], [0, 0, 1, 1], [], []>} : vector<8x8xf32>, vector<8x32xf32>, vector<8x32xf32> -> vector<8x32xf32>
    %c0_42 = arith.constant 0 : index
    %c0_43 = arith.constant 0 : index
    %65 = vector.load %arg10[%c0_42, %c0_43] : memref<1x32xf32, #tpu.memory_space<vmem>>, vector<1x32xf32>
    %66 = vector.broadcast %65 : vector<1x32xf32> to vector<8x32xf32>
    %67 = arith.mulf %63, %66 : vector<8x32xf32>
    %68 = arith.subf %64, %67 : vector<8x32xf32>
    %69 = vector.broadcast %65 : vector<1x32xf32> to vector<8x32xf32>
    %70 = arith.mulf %15, %69 : vector<8x32xf32>
    %71 = arith.mulf %15, %26 : vector<8x32xf32>
    %cst_44 = arith.constant dense<0.000000e+00> : vector<8xf32>
    %72 = vector.multi_reduction <add>, %71, %cst_44 [1] : vector<8x32xf32> to vector<8xf32>
    %73 = vector.shape_cast %72 : vector<8xf32> to vector<8x1xf32>
    %74 = tpu.iota {dimensions = array<i32: 0>} : vector<8x1xi32>
    %75 = vector.broadcast %arg0 : i32 to vector<8x1xi32>
    %76 = arith.cmpi sle, %74, %75 : vector<8x1xi32>
    %cst_45 = arith.constant 0.000000e+00 : f32
    %77 = vector.broadcast %cst_45 : f32 to vector<8x1xf32>
    %78 = arith.select %76, %73, %77 : vector<8x1xi1>, vector<8x1xf32>
    %79 = vector.broadcast %78 : vector<8x1xf32> to vector<8x32xf32>
    %80 = arith.mulf %79, %68 : vector<8x32xf32>
    %81 = arith.addf %70, %80 : vector<8x32xf32>
    %c0_46 = arith.constant 0 : index
    %c0_47 = arith.constant 0 : index
    %c0_48 = arith.constant 0 : index
    %c0_49 = arith.constant 0 : index
    %82 = vector.load %arg8[%c0_46, %c0_47, %c0_48, %c0_49] : memref<1x1x8x32xf32, #tpu.memory_space<vmem>>, vector<1x1x8x32xf32>
    %83 = vector.shape_cast %82 : vector<1x1x8x32xf32> to vector<8x32xf32>
    %84 = vector.shape_cast %81 : vector<8x32xf32> to vector<1x1x8x32xf32>
    tpu.vector_store %arg8[%c0_46, %c0_47, %c0_48, %c0_49], %84 {strides = array<i32>} : memref<1x1x8x32xf32, #tpu.memory_space<vmem>>, vector<1x1x8x32xf32>,
    %c0_50 = arith.constant 0 : index
    %c0_51 = arith.constant 0 : index
    %c0_52 = arith.constant 0 : index
    %c0_53 = arith.constant 0 : index
    %85 = vector.load %arg9[%c0_50, %c0_51, %c0_52, %c0_53] : memref<1x1x8x32xf32, #tpu.memory_space<vmem>>, vector<1x1x8x32xf32>
    %86 = vector.shape_cast %85 : vector<1x1x8x32xf32> to vector<8x32xf32>
    %87 = vector.shape_cast %68 : vector<8x32xf32> to vector<1x1x8x32xf32>
    tpu.vector_store %arg9[%c0_50, %c0_51, %c0_52, %c0_53], %87 {strides = array<i32>} : memref<1x1x8x32xf32, #tpu.memory_space<vmem>>, vector<1x1x8x32xf32>,
    %88 = arith.mulf %26, %68 : vector<8x32xf32>
    %cst_54 = arith.constant dense<0.000000e+00> : vector<32xf32>
    %89 = vector.multi_reduction <add>, %88, %cst_54 [0] : vector<8x32xf32> to vector<32xf32>
    %90 = vector.shape_cast %89 : vector<32xf32> to vector<1x32xf32>
    %91 = arith.addf %65, %90 : vector<1x32xf32>
    %c0_55 = arith.constant 0 : index
    %c0_56 = arith.constant 0 : index
    %92 = vector.load %arg10[%c0_55, %c0_56] : memref<1x32xf32, #tpu.memory_space<vmem>>, vector<1x32xf32>
    tpu.vector_store %arg10[%c0_55, %c0_56], %91 {strides = array<i32>} : memref<1x32xf32, #tpu.memory_space<vmem>>, vector<1x32xf32>,
    return
  }
  func.func @transform_0(%arg0: i32, %arg1: i32) -> (i32, i32, i32, i32) {
    %c0_i32 = arith.constant 0 : i32
    %c0_i32_0 = arith.constant 0 : i32
    %c0_i32_1 = arith.constant 0 : i32
    return %arg0, %arg1, %c0_i32, %c0_i32_0 : i32, i32, i32, i32
  }
  func.func @transform_1(%arg0: i32, %arg1: i32) -> (i32, i32, i32, i32) {
    %c0_i32 = arith.constant 0 : i32
    %c0_i32_0 = arith.constant 0 : i32
    %c0_i32_1 = arith.constant 0 : i32
    return %arg0, %arg1, %c0_i32, %c0_i32_0 : i32, i32, i32, i32
  }
  func.func @transform_2(%arg0: i32, %arg1: i32) -> (i32, i32, i32, i32) {
    %c0_i32 = arith.constant 0 : i32
    %c0_i32_0 = arith.constant 0 : i32
    %c0_i32_1 = arith.constant 0 : i32
    return %arg0, %arg1, %c0_i32, %c0_i32_0 : i32, i32, i32, i32
  }
  func.func @transform_3(%arg0: i32, %arg1: i32) -> (i32, i32, i32, i32) {
    %c0_i32 = arith.constant 0 : i32
    %c0_i32_0 = arith.constant 0 : i32
    %c0_i32_1 = arith.constant 0 : i32
    return %arg0, %arg1, %c0_i32, %c0_i32_0 : i32, i32, i32, i32
  }
  func.func @transform_4(%arg0: i32, %arg1: i32) -> (i32, i32) {
    %c0_i32 = arith.constant 0 : i32
    %c0_i32_0 = arith.constant 0 : i32
    %c0_i32_1 = arith.constant 0 : i32
    return %c0_i32, %c0_i32_0 : i32, i32
  }
  func.func @transform_5(%arg0: i32, %arg1: i32) -> (i32, i32) {
    %c0_i32 = arith.constant 0 : i32
    %c0_i32_0 = arith.constant 0 : i32
    %c0_i32_1 = arith.constant 0 : i32
    return %c0_i32, %c0_i32_0 : i32, i32
  }
  func.func @transform_6(%arg0: i32, %arg1: i32) -> (i32, i32, i32, i32) {
    %c0_i32 = arith.constant 0 : i32
    %c0_i32_0 = arith.constant 0 : i32
    %c0_i32_1 = arith.constant 0 : i32
    return %arg0, %arg1, %c0_i32, %c0_i32_0 : i32, i32, i32, i32
  }
  func.func @transform_7(%arg0: i32, %arg1: i32) -> (i32, i32, i32, i32) {
    %c0_i32 = arith.constant 0 : i32
    %c0_i32_0 = arith.constant 0 : i32
    %c0_i32_1 = arith.constant 0 : i32
    return %arg0, %arg1, %c0_i32, %c0_i32_0 : i32, i32, i32, i32
  }
}

module attributes {stable_mosaic.version = 11 : i64} {
  func.func @_onorm_oproj_kernel(%arg0: i32, %arg1: memref<32x32xf32, #tpu.memory_space<vmem>>, %arg2: memref<32x32xf32, #tpu.memory_space<vmem>>, %arg3: memref<32x4xf32, #tpu.memory_space<vmem>>, %arg4: memref<4x32xf32, #tpu.memory_space<vmem>>, %arg5: memref<1x32xf32, #tpu.memory_space<vmem>>, %arg6: memref<32x32xf32, #tpu.memory_space<vmem>>, %arg7: memref<32x32xf32, #tpu.memory_space<vmem>>) attributes {dimension_semantics = [#tpu.dimension_semantics<parallel>], iteration_bounds = array<i64: 1>, scalar_prefetch = 0 : i64, scratch_operands = 0 : i64, tpu.core_type = #tpu.core_type<tc>, window_params = [{transform_indices = @transform_0, window_bounds = array<i64: 32, 32>}, {transform_indices = @transform_1, window_bounds = array<i64: 32, 32>}, {pipeline_mode = #tpu.pipeline_mode<synchronous>, transform_indices = @transform_2, window_bounds = array<i64: 32, 4>}, {pipeline_mode = #tpu.pipeline_mode<synchronous>, transform_indices = @transform_3, window_bounds = array<i64: 4, 32>}, {pipeline_mode = #tpu.pipeline_mode<synchronous>, transform_indices = @transform_4, window_bounds = array<i64: 1, 32>}, {pipeline_mode = #tpu.pipeline_mode<synchronous>, transform_indices = @transform_5, window_bounds = array<i64: 32, 32>}, {transform_indices = @transform_6, window_bounds = array<i64: 32, 32>}]} {
    %c0 = arith.constant 0 : index
    %c0_0 = arith.constant 0 : index
    %0 = vector.load %arg1[%c0, %c0_0] : memref<32x32xf32, #tpu.memory_space<vmem>>, vector<32x32xf32>
    %1 = arith.mulf %0, %0 : vector<32x32xf32>
    %c0_1 = arith.constant 0 : index
    %c0_2 = arith.constant 0 : index
    %2 = vector.load %arg3[%c0_1, %c0_2] : memref<32x4xf32, #tpu.memory_space<vmem>>, vector<32x4xf32>
    %cst = arith.constant dense<0.000000e+00> : vector<32x4xf32>
    %3 = tpu.matmul %1, %2, %cst {dimension_numbers = #tpu.dot_dimension_numbers<[1], [0], [0], [1], [0, 0, 1, 1], [], []>} : vector<32x32xf32>, vector<32x4xf32>, vector<32x4xf32> -> vector<32x4xf32>
    %cst_3 = arith.constant 1.250000e-01 : f32
    %4 = vector.broadcast %cst_3 : f32 to vector<32x4xf32>
    %5 = arith.mulf %3, %4 : vector<32x4xf32>
    %cst_4 = arith.constant 9.99999997E-7 : f32
    %6 = vector.broadcast %cst_4 : f32 to vector<32x4xf32>
    %7 = arith.addf %5, %6 : vector<32x4xf32>
    %8 = math.rsqrt %7 : vector<32x4xf32>
    %c0_5 = arith.constant 0 : index
    %c0_6 = arith.constant 0 : index
    %9 = vector.load %arg4[%c0_5, %c0_6] : memref<4x32xf32, #tpu.memory_space<vmem>>, vector<4x32xf32>
    %cst_7 = arith.constant dense<0.000000e+00> : vector<32x32xf32>
    %10 = tpu.matmul %8, %9, %cst_7 {dimension_numbers = #tpu.dot_dimension_numbers<[1], [0], [0], [1], [0, 0, 1, 1], [], []>} : vector<32x4xf32>, vector<4x32xf32>, vector<32x32xf32> -> vector<32x32xf32>
    %11 = arith.mulf %0, %10 : vector<32x32xf32>
    %c0_8 = arith.constant 0 : index
    %c0_9 = arith.constant 0 : index
    %12 = vector.load %arg5[%c0_8, %c0_9] : memref<1x32xf32, #tpu.memory_space<vmem>>, vector<1x32xf32>
    %13 = vector.broadcast %12 : vector<1x32xf32> to vector<32x32xf32>
    %14 = arith.mulf %11, %13 : vector<32x32xf32>
    %c0_10 = arith.constant 0 : index
    %c0_11 = arith.constant 0 : index
    %15 = vector.load %arg2[%c0_10, %c0_11] : memref<32x32xf32, #tpu.memory_space<vmem>>, vector<32x32xf32>
    %c0_12 = arith.constant 0 : index
    %c0_13 = arith.constant 0 : index
    %16 = vector.load %arg6[%c0_12, %c0_13] : memref<32x32xf32, #tpu.memory_space<vmem>>, vector<32x32xf32>
    %cst_14 = arith.constant dense<0.000000e+00> : vector<32x32xf32>
    %17 = tpu.matmul %14, %16, %cst_14 {dimension_numbers = #tpu.dot_dimension_numbers<[1], [0], [0], [1], [0, 0, 1, 1], [], []>} : vector<32x32xf32>, vector<32x32xf32>, vector<32x32xf32> -> vector<32x32xf32>
    %18 = arith.addf %15, %17 : vector<32x32xf32>
    %c0_15 = arith.constant 0 : index
    %c0_16 = arith.constant 0 : index
    %19 = vector.load %arg7[%c0_15, %c0_16] : memref<32x32xf32, #tpu.memory_space<vmem>>, vector<32x32xf32>
    tpu.vector_store %arg7[%c0_15, %c0_16], %18 {strides = array<i32>} : memref<32x32xf32, #tpu.memory_space<vmem>>, vector<32x32xf32>,
    return
  }
  func.func @transform_0(%arg0: i32) -> (i32, i32) {
    %c0_i32 = arith.constant 0 : i32
    %c0_i32_0 = arith.constant 0 : i32
    return %arg0, %c0_i32 : i32, i32
  }
  func.func @transform_1(%arg0: i32) -> (i32, i32) {
    %c0_i32 = arith.constant 0 : i32
    %c0_i32_0 = arith.constant 0 : i32
    return %arg0, %c0_i32 : i32, i32
  }
  func.func @transform_2(%arg0: i32) -> (i32, i32) {
    %c0_i32 = arith.constant 0 : i32
    %c0_i32_0 = arith.constant 0 : i32
    %c0_i32_1 = arith.constant 0 : i32
    return %c0_i32, %c0_i32_0 : i32, i32
  }
  func.func @transform_3(%arg0: i32) -> (i32, i32) {
    %c0_i32 = arith.constant 0 : i32
    %c0_i32_0 = arith.constant 0 : i32
    %c0_i32_1 = arith.constant 0 : i32
    return %c0_i32, %c0_i32_0 : i32, i32
  }
  func.func @transform_4(%arg0: i32) -> (i32, i32) {
    %c0_i32 = arith.constant 0 : i32
    %c0_i32_0 = arith.constant 0 : i32
    %c0_i32_1 = arith.constant 0 : i32
    return %c0_i32, %c0_i32_0 : i32, i32
  }
  func.func @transform_5(%arg0: i32) -> (i32, i32) {
    %c0_i32 = arith.constant 0 : i32
    %c0_i32_0 = arith.constant 0 : i32
    %c0_i32_1 = arith.constant 0 : i32
    return %c0_i32, %c0_i32_0 : i32, i32
  }
  func.func @transform_6(%arg0: i32) -> (i32, i32) {
    %c0_i32 = arith.constant 0 : i32
    %c0_i32_0 = arith.constant 0 : i32
    return %arg0, %c0_i32 : i32, i32
  }
}

module attributes {stable_mosaic.version = 11 : i64} {
  func.func @_swiglu_kernel(%arg0: i32, %arg1: i32, %arg2: memref<32x256xf32, #tpu.memory_space<vmem>>, %arg3: memref<256x256xf32, #tpu.memory_space<vmem>>, %arg4: memref<256x256xf32, #tpu.memory_space<vmem>>, %arg5: memref<32x256xf32, #tpu.memory_space<vmem>>) attributes {dimension_semantics = [#tpu.dimension_semantics<parallel>, #tpu.dimension_semantics<parallel>], iteration_bounds = array<i64: 1, 1>, scalar_prefetch = 0 : i64, scratch_operands = 0 : i64, tpu.core_type = #tpu.core_type<tc>, window_params = [{transform_indices = @transform_0, window_bounds = array<i64: 32, 256>}, {transform_indices = @transform_1, window_bounds = array<i64: 256, 256>}, {transform_indices = @transform_2, window_bounds = array<i64: 256, 256>}, {transform_indices = @transform_3, window_bounds = array<i64: 32, 256>}]} {
    %c0 = arith.constant 0 : index
    %c0_0 = arith.constant 0 : index
    %0 = vector.load %arg2[%c0, %c0_0] : memref<32x256xf32, #tpu.memory_space<vmem>>, vector<32x256xf32>
    %c0_1 = arith.constant 0 : index
    %c0_2 = arith.constant 0 : index
    %1 = vector.load %arg3[%c0_1, %c0_2] : memref<256x256xf32, #tpu.memory_space<vmem>>, vector<256x256xf32>
    %cst = arith.constant dense<0.000000e+00> : vector<32x256xf32>
    %2 = tpu.matmul %0, %1, %cst {dimension_numbers = #tpu.dot_dimension_numbers<[1], [0], [0], [1], [0, 0, 1, 1], [], []>} : vector<32x256xf32>, vector<256x256xf32>, vector<32x256xf32> -> vector<32x256xf32>
    %c0_3 = arith.constant 0 : index
    %c0_4 = arith.constant 0 : index
    %3 = vector.load %arg4[%c0_3, %c0_4] : memref<256x256xf32, #tpu.memory_space<vmem>>, vector<256x256xf32>
    %cst_5 = arith.constant dense<0.000000e+00> : vector<32x256xf32>
    %4 = tpu.matmul %0, %3, %cst_5 {dimension_numbers = #tpu.dot_dimension_numbers<[1], [0], [0], [1], [0, 0, 1, 1], [], []>} : vector<32x256xf32>, vector<256x256xf32>, vector<32x256xf32> -> vector<32x256xf32>
    %5 = arith.negf %2 : vector<32x256xf32>
    %6 = math.exp %5 : vector<32x256xf32>
    %cst_6 = arith.constant 1.000000e+00 : f32
    %7 = vector.broadcast %cst_6 : f32 to vector<32x256xf32>
    %8 = arith.addf %7, %6 : vector<32x256xf32>
    %9 = arith.divf %7, %8 : vector<32x256xf32>
    %10 = arith.mulf %2, %9 : vector<32x256xf32>
    %11 = arith.mulf %10, %4 : vector<32x256xf32>
    %c0_7 = arith.constant 0 : index
    %c0_8 = arith.constant 0 : index
    %12 = vector.load %arg5[%c0_7, %c0_8] : memref<32x256xf32, #tpu.memory_space<vmem>>, vector<32x256xf32>
    tpu.vector_store %arg5[%c0_7, %c0_8], %11 {strides = array<i32>} : memref<32x256xf32, #tpu.memory_space<vmem>>, vector<32x256xf32>,
    return
  }
  func.func @transform_0(%arg0: i32, %arg1: i32) -> (i32, i32) {
    %c0_i32 = arith.constant 0 : i32
    %c0_i32_0 = arith.constant 0 : i32
    return %arg0, %c0_i32 : i32, i32
  }
  func.func @transform_1(%arg0: i32, %arg1: i32) -> (i32, i32) {
    %c0_i32 = arith.constant 0 : i32
    %c0_i32_0 = arith.constant 0 : i32
    return %c0_i32, %arg1 : i32, i32
  }
  func.func @transform_2(%arg0: i32, %arg1: i32) -> (i32, i32) {
    %c0_i32 = arith.constant 0 : i32
    %c0_i32_0 = arith.constant 0 : i32
    return %c0_i32, %arg1 : i32, i32
  }
  func.func @transform_3(%arg0: i32, %arg1: i32) -> (i32, i32) {
    %c0_i32 = arith.constant 0 : i32
    return %arg0, %arg1 : i32, i32
  }
}

module attributes {stable_mosaic.version = 11 : i64} {
  func.func @_rms_matmul_kernel(%arg0: i32, %arg1: i32, %arg2: memref<32x32xf32, #tpu.memory_space<vmem>>, %arg3: memref<1x32xf32, #tpu.memory_space<vmem>>, %arg4: memref<32x256xf32, #tpu.memory_space<vmem>>, %arg5: memref<32x256xf32, #tpu.memory_space<vmem>>) attributes {dimension_semantics = [#tpu.dimension_semantics<parallel>, #tpu.dimension_semantics<parallel>], iteration_bounds = array<i64: 1, 1>, scalar_prefetch = 0 : i64, scratch_operands = 0 : i64, tpu.core_type = #tpu.core_type<tc>, window_params = [{transform_indices = @transform_0, window_bounds = array<i64: 32, 32>}, {pipeline_mode = #tpu.pipeline_mode<synchronous>, transform_indices = @transform_1, window_bounds = array<i64: 1, 32>}, {transform_indices = @transform_2, window_bounds = array<i64: 32, 256>}, {transform_indices = @transform_3, window_bounds = array<i64: 32, 256>}]} {
    %c0 = arith.constant 0 : index
    %c0_0 = arith.constant 0 : index
    %0 = vector.load %arg2[%c0, %c0_0] : memref<32x32xf32, #tpu.memory_space<vmem>>, vector<32x32xf32>
    %1 = arith.mulf %0, %0 : vector<32x32xf32>
    %cst = arith.constant dense<0.000000e+00> : vector<32xf32>
    %2 = vector.multi_reduction <add>, %1, %cst [1] : vector<32x32xf32> to vector<32xf32>
    %3 = vector.shape_cast %2 : vector<32xf32> to vector<32x1xf32>
    %cst_1 = arith.constant 3.200000e+01 : f32
    %4 = vector.broadcast %cst_1 : f32 to vector<32x1xf32>
    %5 = arith.divf %3, %4 : vector<32x1xf32>
    %cst_2 = arith.constant 9.99999997E-7 : f32
    %6 = vector.broadcast %cst_2 : f32 to vector<32x1xf32>
    %7 = arith.addf %5, %6 : vector<32x1xf32>
    %8 = math.rsqrt %7 : vector<32x1xf32>
    %9 = vector.broadcast %8 : vector<32x1xf32> to vector<32x32xf32>
    %10 = arith.mulf %0, %9 : vector<32x32xf32>
    %c0_3 = arith.constant 0 : index
    %c0_4 = arith.constant 0 : index
    %11 = vector.load %arg3[%c0_3, %c0_4] : memref<1x32xf32, #tpu.memory_space<vmem>>, vector<1x32xf32>
    %12 = vector.broadcast %11 : vector<1x32xf32> to vector<32x32xf32>
    %13 = arith.mulf %10, %12 : vector<32x32xf32>
    %c0_5 = arith.constant 0 : index
    %c0_6 = arith.constant 0 : index
    %14 = vector.load %arg4[%c0_5, %c0_6] : memref<32x256xf32, #tpu.memory_space<vmem>>, vector<32x256xf32>
    %cst_7 = arith.constant dense<0.000000e+00> : vector<32x256xf32>
    %15 = tpu.matmul %13, %14, %cst_7 {dimension_numbers = #tpu.dot_dimension_numbers<[1], [0], [0], [1], [0, 0, 1, 1], [], []>} : vector<32x32xf32>, vector<32x256xf32>, vector<32x256xf32> -> vector<32x256xf32>
    %c0_8 = arith.constant 0 : index
    %c0_9 = arith.constant 0 : index
    %16 = vector.load %arg5[%c0_8, %c0_9] : memref<32x256xf32, #tpu.memory_space<vmem>>, vector<32x256xf32>
    tpu.vector_store %arg5[%c0_8, %c0_9], %15 {strides = array<i32>} : memref<32x256xf32, #tpu.memory_space<vmem>>, vector<32x256xf32>,
    return
  }
  func.func @transform_0(%arg0: i32, %arg1: i32) -> (i32, i32) {
    %c0_i32 = arith.constant 0 : i32
    %c0_i32_0 = arith.constant 0 : i32
    return %arg0, %c0_i32 : i32, i32
  }
  func.func @transform_1(%arg0: i32, %arg1: i32) -> (i32, i32) {
    %c0_i32 = arith.constant 0 : i32
    %c0_i32_0 = arith.constant 0 : i32
    %c0_i32_1 = arith.constant 0 : i32
    return %c0_i32, %c0_i32_0 : i32, i32
  }
  func.func @transform_2(%arg0: i32, %arg1: i32) -> (i32, i32) {
    %c0_i32 = arith.constant 0 : i32
    %c0_i32_0 = arith.constant 0 : i32
    return %c0_i32, %arg1 : i32, i32
  }
  func.func @transform_3(%arg0: i32, %arg1: i32) -> (i32, i32) {
    %c0_i32 = arith.constant 0 : i32
    return %arg0, %arg1 : i32, i32
  }
}

module attributes {stable_mosaic.version = 11 : i64} {
  func.func @_matmul_res_kernel(%arg0: i32, %arg1: memref<32x256xf32, #tpu.memory_space<vmem>>, %arg2: memref<256x32xf32, #tpu.memory_space<vmem>>, %arg3: memref<32x32xf32, #tpu.memory_space<vmem>>, %arg4: memref<32x32xf32, #tpu.memory_space<vmem>>) attributes {dimension_semantics = [#tpu.dimension_semantics<parallel>], iteration_bounds = array<i64: 1>, scalar_prefetch = 0 : i64, scratch_operands = 0 : i64, tpu.core_type = #tpu.core_type<tc>, window_params = [{transform_indices = @transform_0, window_bounds = array<i64: 32, 256>}, {pipeline_mode = #tpu.pipeline_mode<synchronous>, transform_indices = @transform_1, window_bounds = array<i64: 256, 32>}, {transform_indices = @transform_2, window_bounds = array<i64: 32, 32>}, {transform_indices = @transform_3, window_bounds = array<i64: 32, 32>}]} {
    %c0 = arith.constant 0 : index
    %c0_0 = arith.constant 0 : index
    %0 = vector.load %arg3[%c0, %c0_0] : memref<32x32xf32, #tpu.memory_space<vmem>>, vector<32x32xf32>
    %c0_1 = arith.constant 0 : index
    %c0_2 = arith.constant 0 : index
    %1 = vector.load %arg1[%c0_1, %c0_2] : memref<32x256xf32, #tpu.memory_space<vmem>>, vector<32x256xf32>
    %c0_3 = arith.constant 0 : index
    %c0_4 = arith.constant 0 : index
    %2 = vector.load %arg2[%c0_3, %c0_4] : memref<256x32xf32, #tpu.memory_space<vmem>>, vector<256x32xf32>
    %cst = arith.constant dense<0.000000e+00> : vector<32x32xf32>
    %3 = tpu.matmul %1, %2, %cst {dimension_numbers = #tpu.dot_dimension_numbers<[1], [0], [0], [1], [0, 0, 1, 1], [], []>} : vector<32x256xf32>, vector<256x32xf32>, vector<32x32xf32> -> vector<32x32xf32>
    %4 = arith.addf %0, %3 : vector<32x32xf32>
    %c0_5 = arith.constant 0 : index
    %c0_6 = arith.constant 0 : index
    %5 = vector.load %arg4[%c0_5, %c0_6] : memref<32x32xf32, #tpu.memory_space<vmem>>, vector<32x32xf32>
    tpu.vector_store %arg4[%c0_5, %c0_6], %4 {strides = array<i32>} : memref<32x32xf32, #tpu.memory_space<vmem>>, vector<32x32xf32>,
    return
  }
  func.func @transform_0(%arg0: i32) -> (i32, i32) {
    %c0_i32 = arith.constant 0 : i32
    %c0_i32_0 = arith.constant 0 : i32
    return %arg0, %c0_i32 : i32, i32
  }
  func.func @transform_1(%arg0: i32) -> (i32, i32) {
    %c0_i32 = arith.constant 0 : i32
    %c0_i32_0 = arith.constant 0 : i32
    %c0_i32_1 = arith.constant 0 : i32
    return %c0_i32, %c0_i32_0 : i32, i32
  }
  func.func @transform_2(%arg0: i32) -> (i32, i32) {
    %c0_i32 = arith.constant 0 : i32
    %c0_i32_0 = arith.constant 0 : i32
    return %arg0, %c0_i32 : i32, i32
  }
  func.func @transform_3(%arg0: i32) -> (i32, i32) {
    %c0_i32 = arith.constant 0 : i32
    %c0_i32_0 = arith.constant 0 : i32
    return %arg0, %c0_i32 : i32, i32
  }
}

module attributes {stable_mosaic.version = 11 : i64} {
  func.func @_state_kernel(%arg0: i32, %arg1: i32, %arg2: memref<1x1x16x8xf32, #tpu.memory_space<vmem>>, %arg3: memref<1x1x16x8xf32, #tpu.memory_space<vmem>>, %arg4: memref<1x1x8x8xf32, #tpu.memory_space<vmem>>) attributes {dimension_semantics = [#tpu.dimension_semantics<parallel>, #tpu.dimension_semantics<parallel>], iteration_bounds = array<i64: 2, 4>, scalar_prefetch = 0 : i64, scratch_operands = 0 : i64, tpu.core_type = #tpu.core_type<tc>, window_params = [{transform_indices = @transform_0, window_bounds = array<i64: 1, 1, 16, 8>}, {transform_indices = @transform_1, window_bounds = array<i64: 1, 1, 16, 8>}, {transform_indices = @transform_2, window_bounds = array<i64: 1, 1, 8, 8>}]} {
    %c0 = arith.constant 0 : index
    %c0_0 = arith.constant 0 : index
    %c0_1 = arith.constant 0 : index
    %c0_2 = arith.constant 0 : index
    %0 = vector.load %arg2[%c0, %c0_0, %c0_1, %c0_2] : memref<1x1x16x8xf32, #tpu.memory_space<vmem>>, vector<1x1x16x8xf32>
    %1 = vector.shape_cast %0 : vector<1x1x16x8xf32> to vector<16x8xf32>
    %2 = arith.mulf %1, %1 : vector<16x8xf32>
    %cst = arith.constant dense<0.000000e+00> : vector<16xf32>
    %3 = vector.multi_reduction <add>, %2, %cst [1] : vector<16x8xf32> to vector<16xf32>
    %4 = vector.shape_cast %3 : vector<16xf32> to vector<16x1xf32>
    %cst_3 = arith.constant 0.000000e+00 : f32
    %5 = vector.broadcast %cst_3 : f32 to vector<16x1xf32>
    %6 = arith.cmpf ogt, %4, %5 : vector<16x1xf32>
    %7 = math.rsqrt %4 : vector<16x1xf32>
    %cst_4 = arith.constant 0.000000e+00 : f32
    %8 = vector.broadcast %cst_4 : f32 to vector<16x1xf32>
    %9 = arith.select %6, %7, %8 : vector<16x1xi1>, vector<16x1xf32>
    %10 = vector.broadcast %9 : vector<16x1xf32> to vector<16x8xf32>
    %11 = arith.mulf %1, %10 : vector<16x8xf32>
    %c0_5 = arith.constant 0 : index
    %c0_6 = arith.constant 0 : index
    %c0_7 = arith.constant 0 : index
    %c0_8 = arith.constant 0 : index
    %12 = vector.load %arg3[%c0_5, %c0_6, %c0_7, %c0_8] : memref<1x1x16x8xf32, #tpu.memory_space<vmem>>, vector<1x1x16x8xf32>
    %13 = vector.shape_cast %12 : vector<1x1x16x8xf32> to vector<16x8xf32>
    %cst_9 = arith.constant dense<0.000000e+00> : vector<8x8xf32>
    %14 = tpu.matmul %11, %13, %cst_9 {dimension_numbers = #tpu.dot_dimension_numbers<[0], [0], [1], [1], [0, 1, 1, 1], [], []>} : vector<16x8xf32>, vector<16x8xf32>, vector<8x8xf32> -> vector<8x8xf32>
    %c0_10 = arith.constant 0 : index
    %c0_11 = arith.constant 0 : index
    %c0_12 = arith.constant 0 : index
    %c0_13 = arith.constant 0 : index
    %15 = vector.load %arg4[%c0_10, %c0_11, %c0_12, %c0_13] : memref<1x1x8x8xf32, #tpu.memory_space<vmem>>, vector<1x1x8x8xf32>
    %16 = vector.shape_cast %15 : vector<1x1x8x8xf32> to vector<8x8xf32>
    %17 = vector.shape_cast %14 : vector<8x8xf32> to vector<1x1x8x8xf32>
    tpu.vector_store %arg4[%c0_10, %c0_11, %c0_12, %c0_13], %17 {strides = array<i32>} : memref<1x1x8x8xf32, #tpu.memory_space<vmem>>, vector<1x1x8x8xf32>,
    return
  }
  func.func @transform_0(%arg0: i32, %arg1: i32) -> (i32, i32, i32, i32) {
    %c0_i32 = arith.constant 0 : i32
    %c0_i32_0 = arith.constant 0 : i32
    %c0_i32_1 = arith.constant 0 : i32
    return %arg0, %arg1, %c0_i32, %c0_i32_0 : i32, i32, i32, i32
  }
  func.func @transform_1(%arg0: i32, %arg1: i32) -> (i32, i32, i32, i32) {
    %c0_i32 = arith.constant 0 : i32
    %c0_i32_0 = arith.constant 0 : i32
    %c0_i32_1 = arith.constant 0 : i32
    return %arg0, %arg1, %c0_i32, %c0_i32_0 : i32, i32, i32, i32
  }
  func.func @transform_2(%arg0: i32, %arg1: i32) -> (i32, i32, i32, i32) {
    %c0_i32 = arith.constant 0 : i32
    %c0_i32_0 = arith.constant 0 : i32
    %c0_i32_1 = arith.constant 0 : i32
    return %arg0, %arg1, %c0_i32, %c0_i32_0 : i32, i32, i32, i32
  }
}

</mosaic_0001>

<bundles_post_ra>
// kernel: tile.8
= control target key start
LH: loop header
LB: loop body
LE: loop exit
PB: predicated region body
PF: predicated region fallthrough
CT: control target
= control target key end

     0   :  { %s22_s0 = inlined_call_operand.vmem [shape: f32[8], index: 0, kind: input, shape index: {}]   ;;  %s23_s1 = inlined_call_operand.vmem [shape: f32[4,8], index: 1, kind: output, shape index: {}]  }
   0x1   :  { %v4_v0 = vld [vmem:[%s22_s0] ss:$0 sm:$0xff] }
   0x2   :  { %5 = vst [vmem:[%s23_s1] sm:$0xf] %v4_v0 }

// kernel: tile.9
= control target key start
LH: loop header
LB: loop body
LE: loop exit
PB: predicated region body
PF: predicated region fallthrough
CT: control target
= control target key end

     0   :  { %vm7_vm0 = vcmask 64512   ;;  %s37_s8 = smov 8   ;;  %s38_s9 = smov 16   ;;  %vm13_vm1 = vcmask 261312   ;;  %vm19_vm2 = vcmask 195712   ;;  %vm25_vm3 = vcmask 130112   ;;  %s55_s0 = inlined_call_operand.vmem [shape: f32[4,8], index: 0, kind: input, shape index: {}]   ;;  %s56_s1 = inlined_call_operand.vmem [shape: f32[1,32], index: 1, kind: output, shape index: {}]  }
   0x1   :  { %v4_v0 = vld [vmem:[%s55_s0] sm:$0xf]  ;;  %s36_s0 = smov 24  }
   0x2   :  { %5 = vst [vmem:[#allocation1] sm:$0xf] %v4_v0 }
   0x9   :  { %v10_v1 = vld [vmem:[#allocation1 + $0x3] sm:$0x1]   ;;  %v22_v2 = vld [vmem:[#allocation1 + $0x1] sm:$0x1]   ;;  %v6_v3 = vld [vmem:[#allocation1] sm:$0x1]  }
   0xa   :  { %11 = vrot.lane.b32.xlu0 %v10_v1, %s36_s0  ;;  %23 = vrot.lane.b32.xlu1 %v22_v2, %s37_s8  ;;  %v16_v4 = vld [vmem:[#allocation1 + $0x2] sm:$0x1]   ;;  %8 = vst.msk [vmem:[#allocation0] sm:$0x1] %vm7_vm0, %v6_v3  }
   0xe   :  { %17 = vrot.lane.b32.xlu0 %v16_v4, %s38_s9 }
  0x7c   :  { %v12_v5 = vpop.permute.xlu0 %11   ;;  %v24_v6 = vpop.permute.xlu1 %23  }
  0x7d   :  { %14 = vst.msk [vmem:[#allocation0] sm:$0x1] %vm13_vm1, %v12_v5  }
  0x80   :  { %v18_v7 = vpop.permute.xlu0 %17  }
  0x81   :  { %20 = vst.msk [vmem:[#allocation0] sm:$0x1] %vm19_vm2, %v18_v7  }
  0x82   :  { %26 = vst.msk [vmem:[#allocation0] sm:$0x1] %vm25_vm3, %v24_v6  }
  0x89   :  { %v30_v8 = vld [vmem:[#allocation0] sm:$0x1] }
  0x8a   :  { %32 = vst [vmem:[%s56_s1] sm:$0x1] %v30_v8 }

// kernel: deltanet_block_forward.8
= control target key start
LH: loop header
LB: loop body
LE: loop exit
PB: predicated region body
PF: predicated region fallthrough
CT: control target
= control target key end

     0   :  { %vm22_vm0 = vcmask 261120   ;;  %vm164_vm1 = vcmask 818176   ;;  %s287_s0 = inlined_call_operand.vmem [shape: f32[32,32], index: 0, kind: input, shape index: {}]   ;;  %s288_s2 = inlined_call_operand.vmem [shape: f32[32,100], index: 2, kind: input, shape index: {}]   ;;  %s289_s1 = inlined_call_operand.vmem [shape: f32[1,32], index: 1, kind: input, shape index: {}]   ;;  %s290_s3 = inlined_call_operand.vmem [shape: f32[32,100], index: 3, kind: output, shape index: {}]  }
   0x1   :  { %v14_v0 = vld [vmem:[%s287_s0] sm:$0xff]  ;;  %v15_v1 = vld [vmem:[%s287_s0 + $0x8] sm:$0xff]  ;;  %v16_v2 = vld [vmem:[%s287_s0 + $0x10] sm:$0xff] }
   0x2   :  { %v18_v3 = vmul.f32 %v14_v0, %v14_v0  ;;  %v19_v4 = vmul.f32 %v15_v1, %v15_v1  ;;  %v20_v5 = vmul.f32 %v16_v2, %v16_v2  ;;  %v17_v6 = vld [vmem:[%s287_s0 + $0x18] sm:$0xff]  ;;  %v63_v12 = vld [vmem:[%s288_s2] sm:$0xff]  ;;  %v64_v13 = vld [vmem:[%s288_s2 + $0x8] sm:$0xff] }
   0x3   :  { %v21_v7 = vmul.f32 %v17_v6, %v17_v6  ;;  %v65_v14 = vld [vmem:[%s288_s2 + $0x10] sm:$0xff]  ;;  %v200_v15 = vpack.c.bf16 %v64_v13, %v63_v12  ;;  %v66_v16 = vld [vmem:[%s288_s2 + $0x18] sm:$0xff]  ;;  %v173_v31 = vld [vmem:[%s289_s1] ss:$0 sm:$0xff] }
   0x4   :  { %v23_v8 = vsel %vm22_vm0, %v18_v3, 0.0  ;;  %v26_v9 = vsel %vm22_vm0, %v19_v4, 0.0  ;;  %v29_v10 = vsel %vm22_vm0, %v20_v5, 0.0  ;;  %v204_v17 = vpack.c.bf16 %v66_v16, %v65_v14 }
   0x5   :  { %24 = vadd.xlane.f32.xlu0 %v23_v8  ;;  %27 = vadd.xlane.f32.xlu1 %v26_v9  ;;  %v32_v11 = vsel %vm22_vm0, %v21_v7, 0.0 }
   0x6   :  { %201 = vmatprep.subr.bf16.mxu0 %v200_v15  ;;  %208 = vmatprep.subr.bf16.mxu1 %v200_v15 }
   0x7   :  { %203 = vmatpush3.bf16.msra.mxu0 %v200_v15  ;;  %210 = vmatpush3.bf16.msra.mxu1 %v200_v15 }
   0x8   :  { %205 = vmatprep.subr.bf16.mxu0 %v204_v17  ;;  %209 = vmatprep.subr.bf16.mxu1 %v204_v17 }
   0x9   :  { %30 = vadd.xlane.f32.xlu0 %v29_v10  ;;  %33 = vadd.xlane.f32.xlu1 %v32_v11 }
   0xb   :  { %207 = vmatpush3.bf16.msra.mxu0 %v204_v17  ;;  %211 = vmatpush3.bf16.msra.mxu1 %v204_v17 }
  0x92   :  { %v25_v18 = vpop.xlane.xlu0 %24  ;;  %v28_v19 = vpop.xlane.xlu1 %27 }
  0x93   :  { %v36_v20 = vmul.f32 0.03125, %v25_v18  ;;  %v37_v21 = vmul.f32 0.03125, %v28_v19 }
  0x95   :  { %v40_v22 = vadd.f32 1e-06, %v36_v20  ;;  %v41_v23 = vadd.f32 1e-06, %v37_v21 }
  0x96   :  { %v31_v24 = vpop.xlane.xlu0 %30  ;;  %v34_v25 = vpop.xlane.xlu1 %33 }
  0x97   :  { %212 = vrsqrt.f32 %v40_v22  ;;  %v38_v26 = vmul.f32 0.03125, %v31_v24  ;;  %v39_v27 = vmul.f32 0.03125, %v34_v25 }
  0x98   :  { %214 = vrsqrt.f32 %v41_v23 }
  0x99   :  { %v42_v28 = vadd.f32 1e-06, %v38_v26  ;;  %v43_v29 = vadd.f32 1e-06, %v39_v27 }
  0x9b   :  { %216 = vrsqrt.f32 %v42_v28 }
  0x9c   :  { %218 = vrsqrt.f32 %v43_v29 }
  0xa1   :  { %v213_v30 = vpop.eup %212 }
  0xa2   :  { %v215_v32 = vpop.eup %214  ;;  %v48_v33 = vmul.f32 %v213_v30, %v14_v0 }
  0xa3   :  { %v49_v34 = vmul.f32 %v215_v32, %v15_v1 }
  0xa4   :  { %v59_v35 = vmul.f32 %v173_v31, %v48_v33 }
  0xa5   :  { %v217_v36 = vpop.eup %216  ;;  %v60_v37 = vmul.f32 %v173_v31, %v49_v34 }
  0xa6   :  { %v219_v38 = vpop.eup %218  ;;  %194 = vmatprep.mubr.msk.f32.mxu0 %vm22_vm0, %v59_v35  ;;  %v50_v39 = vmul.f32 %v217_v36, %v16_v2 }
  0xa7   :  { %195 = vmatmul.mubr.msk.f32.vlgmr.msra.gmra.mrb[0].mxu0 %vm22_vm0, %v60_v37  ;;  %v51_v40 = vmul.f32 %v219_v38, %v17_v6 }
  0xa8   :  { %v61_v41 = vmul.f32 %v173_v31, %v50_v39 }
  0xa9   :  { %v62_v42 = vmul.f32 %v173_v31, %v51_v40 }
  0xaa   :  { %197 = vmatprep.mubr.msk.f32.mxu1 %vm22_vm0, %v61_v41 }
  0xab   :  { %198 = vmatmul.mubr.msk.f32.vlgmr.msra.gmra.mrb[0].mxu1 %vm22_vm0, %v62_v42 }
 0x17a   :  { %v196_v43 = vpop.f32.mrb[0].mxu0 }
 0x17b   :  { %166 = vst.msk [vmem:[%s290_s3 + $0x8] sm:$0xff] %vm164_vm1, %v196_v43  ;;  %v145_v44 = vpop.f32.mrb[1].mxu0 }
 0x17c   :  { %165 = vst.msk [vmem:[%s290_s3] sm:$0xff] %vm164_vm1, %v145_v44 }
 0x17e   :  { %v199_v45 = vpop.f32.mrb[0].mxu1 }
 0x17f   :  { %168 = vst.msk [vmem:[%s290_s3 + $0x18] sm:$0xff] %vm164_vm1, %v199_v45  ;;  %v155_v46 = vpop.f32.mrb[1].mxu1 }
 0x180   :  { %167 = vst.msk [vmem:[%s290_s3 + $0x10] sm:$0xff] %vm164_vm1, %v155_v46 }

// kernel: deltanet_block_forward.9
= control target key start
LH: loop header
LB: loop body
LE: loop exit
PB: predicated region body
PF: predicated region fallthrough
CT: control target
= control target key end

     0   :  { %s458_s9 = smov 0   ;;  %s460_s10 = smov 0   ;;  %s510_s0 = inlined_call_operand.vmem [shape: f32[2,16,96], index: 0, kind: input, shape index: {}]   ;;  %s511_s1 = inlined_call_operand.vmem [shape: f32[4,96], index: 1, kind: input, shape index: {}]   ;;  %s512_s2 = inlined_call_operand.vmem [shape: f32[2,16,96], index: 2, kind: output, shape index: {}]  }
   0x1   :  { %s462_s11 = smov 0  }
   0x2 LB: > { %s24_s12 = sadd.s32 1, %s437_s10  ;;  %p376_p0 = scmp.ge.s32.totalorder %s441_s11, 1  ;;  %s441_s11 = sphi %s462_s11, %s12_s11   ;;  %s437_s10 = sphi %s460_s10, %s514_s10   ;;  %s433_s9 = sphi %s458_s9, %s513_s9  }
   0x3   : > { %p26_p1 = scmp.ge.s32.totalorder %s24_s12, 2  ;;  %p140_p2 = scmp.lt.s32.totalorder %s441_s11, 3 }
   0x5   : > { %s516_s12 = smov (%p26_p1, %s24_s12), 0  ;;  %p141_p3 = pnand %p376_p0, %p140_p2 }
   0x6   : > { %p172_p4 = scmp.lt.s32.totalorder (!%p141_p3), %s433_s9, 1  ;;  %v195_v0 = vlaneseq (!%p141_p3)  ;;  %v194_v2 = vld [vmem:[%s511_s1] sm:$0xf] (!%p141_p3)  ;;  %vm269_vm6 = vcmask (!%p141_p3), 785408  }
   0x7   : > { %144 = sbr.rel (%p141_p3) target bundleno = 60 (0x3c), region = 28 }
   0x8   : > { %v196_v1 = vshrl.u32 (!%p141_p3), %v195_v0, 7 }
   0xa   : > { %v200_v3 = vsub.s32 (!%p141_p3), 3, %v196_v1  ;;  %vm204_vm0 = vcmp.ge.s32.totalorder (!%p141_p3), %v196_v1, 3  ;;  %vm208_vm1 = vcmp.lt.s32.totalorder (!%p141_p3), %v196_v1, 3  ;;  %v215_v4 = vsub.s32 (!%p141_p3), 0, %v196_v1 }
   0xb   : > { %vm221_vm2 = vcmp.ge.s32.totalorder (!%p141_p3), %v196_v1, 2  ;;  %vm225_vm3 = vcmp.lt.s32.totalorder (!%p141_p3), %v196_v1, 2  ;;  %v232_v5 = vsub.s32 (!%p141_p3), 1, %v196_v1  ;;  %vm238_vm4 = vcmp.ge.s32.totalorder (!%p141_p3), %v196_v1, 1 }
   0xc   : > { %v201_v8 = vrot.slane (!%p141_p3), %v194_v2, %v200_v3  ;;  %v216_v9 = vrot.slane (!%p141_p3), %v194_v2, %v215_v4  ;;  %vm242_vm5 = vcmp.lt.s32.totalorder (!%p141_p3), %v196_v1, 1  ;;  %v249_v10 = vsub.s32 (!%p141_p3), 2, %v196_v1 }
   0xd   : > { %v233_v17 = vrot.slane (!%p141_p3), %v194_v2, %v232_v5 }
   0xe   : > { %s518_s9 = smov (!%p172_p4, %s433_s9), 1  ;;  %v250_v22 = vrot.slane %v194_v2, %v249_v10 }
   0xf   : > { %s385_s15 = sshll.u32 %s518_s9, 4 }
  0x10   : > { %s179_s18 = scalar_lea.vmem %s510_s0, %s385_s15  ;;  %s191_s21 = scalar_lea.vmem %s512_s2, %s385_s15 }
  0x11   : > { %v192_v6 = vld [vmem:[%s179_s18] sm:$0xff]  ;;  %v193_v7 = vld [vmem:[%s179_s18 + $0x8] sm:$0xff] }
  0x12   : > { %v206_v11 = vrot.slane %v192_v6, 5  ;;  %v207_v12 = vrot.slane %v193_v7, 5  ;;  %v223_v13 = vrot.slane %v192_v6, 6  ;;  %v224_v14 = vrot.slane %v193_v7, 6 }
  0x13   : > { %v202_v15 = vmul.f32 %v201_v8, %v192_v6  ;;  %v203_v16 = vmul.f32 %v201_v8, %v193_v7  ;;  %v240_v18 = vrot.slane %v192_v6, 7  ;;  %v241_v21 = vrot.slane %v193_v7, 7 }
  0x14   : > { %v210_v19 = vsel %vm208_vm1, %v207_v12, %v206_v11  ;;  %v227_v20 = vsel %vm225_vm3, %v224_v14, %v223_v13  ;;  %v209_v25 = vsel %vm208_vm1, %v206_v11, %v207_v12  ;;  %v226_v26 = vsel %vm225_vm3, %v223_v13, %v224_v14 }
  0x15   : > { %v211_v23 = vsel %vm204_vm0, %v210_v19, 0.0  ;;  %v228_v24 = vsel %vm221_vm2, %v227_v20, 0.0  ;;  %v244_v29 = vsel %vm242_vm5, %v241_v21, %v240_v18  ;;  %v218_v30 = vmul.f32 %v216_v9, %v209_v25 }
  0x16   : > { %v217_v27 = vmul.f32 %v216_v9, %v211_v23  ;;  %v234_v28 = vmul.f32 %v233_v17, %v228_v24  ;;  %v245_v31 = vsel %vm238_vm4, %v244_v29, 0.0  ;;  %v235_v32 = vmul.f32 %v233_v17, %v226_v26 }
  0x17   : > { %v243_v33 = vsel %vm242_vm5, %v240_v18, %v241_v21  ;;  %v251_v35 = vmul.f32 %v250_v22, %v245_v31  ;;  %v220_v36 = vadd.f32 %v218_v30, %v203_v16 }
  0x18   : > { %v219_v34 = vadd.f32 %v217_v27, %v202_v15  ;;  %v252_v37 = vmul.f32 %v250_v22, %v243_v33 }
  0x19   : > { %v237_v39 = vadd.f32 %v235_v32, %v220_v36 }
  0x1a   : > { %v236_v38 = vadd.f32 %v234_v28, %v219_v34 }
  0x1b   : > { %v254_v41 = vadd.f32 %v252_v37, %v237_v39 }
  0x1c   : > { %v253_v40 = vadd.f32 %v251_v35, %v236_v38 }
  0x1d   : > { %v382_v43 = vmul.f32 -1.442695, %v254_v41 }
  0x1e   : > { %v381_v42 = vmul.f32 -1.442695, %v253_v40 }
  0x20   : > { %411 = vpow2.f32 %v381_v42 }
  0x21   : > { %413 = vpow2.f32 %v382_v43 }
  0x2a   : > { %v412_v44 = vpop.eup %411 }
  0x2b   : > { %v414_v45 = vpop.eup %413  ;;  %v261_v46 = vadd.f32 1.0, %v412_v44 }
  0x2c   : > { %v262_v47 = vadd.f32 1.0, %v414_v45 }
  0x2d   : > { %415 = vrcp.f32 %v261_v46 }
  0x2e   : > { %417 = vrcp.f32 %v262_v47 }
  0x37   : > { %v416_v48 = vpop.eup %415 }
  0x38   : > { %v418_v49 = vpop.eup %417  ;;  %v267_v50 = vmul.f32 %v416_v48, %v253_v40 }
  0x39   : > { %v268_v51 = vmul.f32 %v418_v49, %v254_v41 }
  0x3a   : > { %270 = vst.msk [vmem:[%s191_s21] sm:$0xff] %vm269_vm6, %v267_v50 }
  0x3b   : > { %271 = vst.msk [vmem:[%s191_s21 + $0x8] sm:$0xff] %vm269_vm6, %v268_v51 }
  0x3c PF: > { %s12_s11 = sadd.s32 1, %s441_s11   ;;  %s513_s9 = smov %s437_s10 }
  0x3d   : > { %p9_p5 = scmp.ge.s32.totalorder %s12_s11, 4   ;;  %s514_s10 = smov %s516_s12 }
  0x3f   :  { %11 = sbr.rel (!%p9_p5) target bundleno = 2 (0x2), region = 61 }

// kernel: deltanet_block_forward.12
= control target key start
LH: loop header
LB: loop body
LE: loop exit
PB: predicated region body
PF: predicated region fallthrough
CT: control target
= control target key end

     0   :  { %vm35_vm0 = vcmask 261120   ;;  %vm159_vm1 = vcmask 1043456   ;;  %vm146_vm2 = vcmask 31744   ;;  %s593_s2 = inlined_call_operand.vmem [shape: f32[32,4], index: 2, kind: input, shape index: {}]   ;;  %s594_s0 = inlined_call_operand.vmem [shape: f32[32,32], index: 0, kind: input, shape index: {}]   ;;  %s595_s3 = inlined_call_operand.vmem [shape: f32[4,32], index: 3, kind: input, shape index: {}]   ;;  %s596_s5 = inlined_call_operand.vmem [shape: f32[32,32], index: 5, kind: input, shape index: {}]   ;;  %s597_s4 = inlined_call_operand.vmem [shape: f32[1,32], index: 4, kind: input, shape index: {}]   ;;  %s598_s1 = inlined_call_operand.vmem [shape: f32[32,32], index: 1, kind: input, shape index: {}]   ;;  %s599_s6 = inlined_call_operand.vmem [shape: f32[32,32], index: 6, kind: output, shape index: {}]  }
   0x1   :  { %v31_v0 = vld [vmem:[%s593_s2] sm:$0xff]  ;;  %v32_v1 = vld [vmem:[%s593_s2 + $0x8] sm:$0xff]  ;;  %v33_v2 = vld [vmem:[%s593_s2 + $0x10] sm:$0xff] }
   0x2   :  { %v451_v3 = vpack.c.bf16 %v32_v1, %v31_v0  ;;  %v34_v4 = vld [vmem:[%s593_s2 + $0x18] sm:$0xff]  ;;  %v525_v5 = vld [vmem:[%s594_s0] sm:$0xff]  ;;  %v24_v8 = vld [vmem:[%s594_s0 + $0x8] sm:$0xff] }
   0x3   :  { %v455_v6 = vpack.c.bf16 %v34_v4, %v33_v2  ;;  %v27_v7 = vmul.f32 %v525_v5, %v525_v5  ;;  %v25_v9 = vld [vmem:[%s594_s0 + $0x10] sm:$0xff]  ;;  %v28_v10 = vmul.f32 %v24_v8, %v24_v8  ;;  %v26_v12 = vld [vmem:[%s594_s0 + $0x18] sm:$0xff]  ;;  %v145_v14 = vld [vmem:[%s595_s3] sm:$0xf] }
   0x4   :  { %452 = vmatprep.subr.bf16.mxu0 %v451_v3  ;;  %v29_v11 = vmul.f32 %v25_v9, %v25_v9  ;;  %v30_v13 = vmul.f32 %v26_v12, %v26_v12  ;;  %429 = vmatprep.subr.msk.mxu1 %vm159_vm1, %v145_v14  ;;  %v267_v15 = vld [vmem:[%s596_s5] sm:$0xff]  ;;  %v268_v16 = vld [vmem:[%s596_s5 + $0x8] sm:$0xff]  ;;  %v269_v34 = vld [vmem:[%s596_s5 + $0x10] sm:$0xff] }
   0x5   :  { %454 = vmatpush3.bf16.msra.mxu0 %v451_v3  ;;  %423 = vmatprep.mubr.msk.f32.mxu0 %vm35_vm0, %v27_v7  ;;  %v459_v17 = vpack.c.bf16 %v268_v16, %v267_v15  ;;  %v270_v35 = vld [vmem:[%s596_s5 + $0x18] sm:$0xff]  ;;  %v389_v39 = vld [vmem:[%s597_s4] ss:$0 sm:$0xff]  ;;  %v264_v50 = vld [vmem:[%s598_s1 + $0x8] sm:$0xff] }
   0x6   :  { %456 = vmatprep.subr.bf16.mxu0 %v455_v6  ;;  %430 = vmatpush3.msk.msra.mxu1 %vm159_vm1, %v145_v14  ;;  %v463_v36 = vpack.c.bf16 %v270_v35, %v269_v34  ;;  %v263_v51 = vld [vmem:[%s598_s1] sm:$0xff]  ;;  %v266_v56 = vld [vmem:[%s598_s1 + $0x18] sm:$0xff]  ;;  %v265_v57 = vld [vmem:[%s598_s1 + $0x10] sm:$0xff] }
   0x7   :  { %460 = vmatprep.subr.bf16.mxu1 %v459_v17 }
   0x9   :  { %458 = vmatpush3.bf16.msra.mxu0 %v455_v6 }
   0xc   :  { %424 = vmatmul.mubr.msk.f32.vlgmr.msra.gmra.mrb[0].mxu0 %vm35_vm0, %v28_v10 }
   0xd   :  { %426 = vmatprep.mubr.msk.f32.mxu0 %vm35_vm0, %v29_v11 }
  0x10   :  { %427 = vmatmul.mubr.msk.f32.gmra.mrb[2].mxu0 %vm35_vm0, %v30_v13 }
  0xdf   :  { %v425_v18 = vpop.f32.mrb[0].mxu0 }
  0xe0   :  { %v134_v19 = vmul.f32 0.125, %v425_v18  ;;  %v114_v20 = vpop.f32.mrb[1].mxu0 }
  0xe1   :  { %v133_v21 = vmul.f32 0.125, %v114_v20 }
  0xe2   :  { %v138_v22 = vadd.f32 1e-06, %v134_v19 }
  0xe3   :  { %v137_v23 = vadd.f32 1e-06, %v133_v21  ;;  %v428_v24 = vpop.f32.mrb[2].mxu0 }
  0xe4   :  { %v136_v25 = vmul.f32 0.125, %v428_v24  ;;  %v124_v26 = vpop.f32.mrb[3].mxu0 }
  0xe5   :  { %467 = vrsqrt.f32 %v137_v23  ;;  %v135_v27 = vmul.f32 0.125, %v124_v26 }
  0xe6   :  { %469 = vrsqrt.f32 %v138_v22  ;;  %v140_v28 = vadd.f32 1e-06, %v136_v25 }
  0xe7   :  { %v139_v29 = vadd.f32 1e-06, %v135_v27 }
  0xe9   :  { %471 = vrsqrt.f32 %v139_v29 }
  0xea   :  { %473 = vrsqrt.f32 %v140_v28 }
  0xef   :  { %v468_v30 = vpop.eup %467 }
  0xf0   :  { %v470_v31 = vpop.eup %469  ;;  %431 = vmatprep.mubr.msk.f32.mxu1 %vm146_vm2, %v468_v30 }
  0xf1   :  { %432 = vmatmul.mubr.msk.f32.vlgmr.msra.gmra.mrb[0].mxu1 %vm146_vm2, %v470_v31 }
  0xf2   :  { %462 = vmatpush3.bf16.msra.mxu1 %v459_v17 }
  0xf3   :  { %v472_v32 = vpop.eup %471  ;;  %464 = vmatprep.subr.bf16.mxu1 %v463_v36 }
  0xf4   :  { %v474_v33 = vpop.eup %473  ;;  %434 = vmatprep.mubr.msk.f32.mxu1 %vm146_vm2, %v472_v32 }
  0xf5   :  { %435 = vmatmul.mubr.msk.f32.gmra.mrb[2].mxu1 %vm146_vm2, %v474_v33 }
  0xf6   :  { %466 = vmatpush3.bf16.msra.mxu1 %v463_v36 }
 0x1c4   :  { %v433_v37 = vpop.f32.mrb[0].mxu1 }
 0x1c5   :  { %v249_v38 = vmul.f32 %v433_v37, %v24_v8  ;;  %v229_v40 = vpop.f32.mrb[1].mxu1 }
 0x1c6   :  { %v248_v41 = vmul.f32 %v229_v40, %v525_v5 }
 0x1c7   :  { %v260_v44 = vmul.f32 %v389_v39, %v249_v38 }
 0x1c8   :  { %v259_v42 = vmul.f32 %v389_v39, %v248_v41  ;;  %v436_v43 = vpop.f32.mrb[2].mxu1 }
 0x1c9   :  { %v251_v45 = vmul.f32 %v436_v43, %v26_v12  ;;  %v239_v46 = vpop.f32.mrb[3].mxu1 }
 0x1ca   :  { %v250_v47 = vmul.f32 %v239_v46, %v25_v9  ;;  %445 = vmatprep.mubr.msk.f32.mxu1 %vm35_vm0, %v259_v42 }
 0x1cb   :  { %446 = vmatmul.mubr.msk.f32.vlgmr.msra.gmra.mrb[4].mxu1 %vm35_vm0, %v260_v44  ;;  %v262_v49 = vmul.f32 %v389_v39, %v251_v45 }
 0x1cc   :  { %v261_v48 = vmul.f32 %v389_v39, %v250_v47 }
 0x1ce   :  { %448 = vmatprep.mubr.msk.f32.mxu1 %vm35_vm0, %v261_v48 }
 0x1cf   :  { %449 = vmatmul.mubr.msk.f32.gmra.mrb[6].mxu1 %vm35_vm0, %v262_v49 }
 0x29e   :  { %v447_v52 = vpop.f32.mrb[4].mxu1 }
 0x29f   :  { %v369_v53 = vadd.f32 %v447_v52, %v264_v50  ;;  %v349_v54 = vpop.f32.mrb[5].mxu1 }
 0x2a0   :  { %v368_v55 = vadd.f32 %v349_v54, %v263_v51 }
 0x2a1   :  { %373 = vst.msk [vmem:[%s599_s6 + $0x8] sm:$0xff] %vm35_vm0, %v369_v53 }
 0x2a2   :  { %372 = vst.msk [vmem:[%s599_s6] sm:$0xff] %vm35_vm0, %v368_v55  ;;  %v450_v58 = vpop.f32.mrb[6].mxu1 }
 0x2a3   :  { %v371_v59 = vadd.f32 %v450_v58, %v266_v56  ;;  %v359_v60 = vpop.f32.mrb[7].mxu1 }
 0x2a4   :  { %v370_v61 = vadd.f32 %v359_v60, %v265_v57 }
 0x2a5   :  { %375 = vst.msk [vmem:[%s599_s6 + $0x18] sm:$0xff] %vm35_vm0, %v371_v59 }
 0x2a6   :  { %374 = vst.msk [vmem:[%s599_s6 + $0x10] sm:$0xff] %vm35_vm0, %v370_v61 }

// kernel: deltanet_block_forward.10
= control target key start
LH: loop header
LB: loop body
LE: loop exit
PB: predicated region body
PF: predicated region fallthrough
CT: control target
= control target key end

     0   :  { %s1859_s24 = smov 0   ;;  %s1861_s25 = smov 0   ;;  %s2045_s0 = inlined_call_operand.vmem [shape: f32[2,2,8,32], index: 0, kind: input, shape index: {}]   ;;  %s2046_s1 = inlined_call_operand.vmem [shape: f32[2,2,8,32], index: 1, kind: input, shape index: {}]   ;;  %s2047_s2 = inlined_call_operand.vmem [shape: f32[2,2,8,32], index: 2, kind: input, shape index: {}]   ;;  %s2048_s3 = inlined_call_operand.vmem [shape: f32[2,2,8,4], index: 3, kind: input, shape index: {}]   ;;  %s2049_s4 = inlined_call_operand.vmem [shape: f32[32,4], index: 4, kind: input, shape index: {}]   ;;  %s2050_s5 = inlined_call_operand.vmem [shape: f32[4,32], index: 5, kind: input, shape index: {}]   ;;  %s2051_s6 = inlined_call_operand.vmem [shape: f32[2,2,8,32], index: 6, kind: output, shape index: {0}]   ;;  %s2052_s7 = inlined_call_operand.vmem [shape: f32[2,2,8,32], index: 7, kind: output, shape index: {1}]  }
   0x1   :  { %2053 = sst [smem:[#allocation3_spill]] %s2045_s0  ;;  %s1863_s26 = smov 0  }
   0x2   :  { %s1865_s27 = smov 0   ;;  %s1867_s28 = smov 0  }
   0x3 LB: > { %s27_s29 = sadd.s32 1, %s1805_s26  ;;  %s30_s30 = sadd.s32 1, %s1809_s27  ;;  %s1813_s28 = sphi %s1867_s28, %s18_s28   ;;  %s1809_s27 = sphi %s1865_s27, %s2058_s27   ;;  %s1805_s26 = sphi %s1863_s26, %s2057_s26   ;;  %s1801_s25 = sphi %s1861_s25, %s2056_s25   ;;  %s1797_s24 = sphi %s1859_s24, %s2055_s24  }
   0x4   : > { %p28_p0 = scmp.ge.s32.totalorder %s27_s29, 2  ;;  %p1575_p1 = scmp.ge.s32.totalorder %s1813_s28, 1 }
   0x5   : > { %p306_p2 = scmp.lt.s32.totalorder %s1813_s28, 5 }
   0x6   : > { %s2060_s29 = smov (%p28_p0, %s27_s29), 0  ;;  %s2062_s30 = smov (!%p28_p0, %s30_s30), %s1809_s27 }
   0x7   : > { %p307_p3 = pnand %p1575_p1, %p306_p2  ;;  %p32_p4 = scmp.ge.s32.totalorder %s2062_s30, 2 }
   0x8   : > { %p376_p5 = scmp.lt.s32.totalorder (!%p307_p3), %s1801_s25, 1  ;;  %p378_p6 = scmp.lt.s32.totalorder (!%p307_p3), %s1797_s24, 1 }
   0x9   : > { %s2064_s30 = smov (%p32_p4, %s2062_s30), 0  ;;  %310 = sbr.rel (%p307_p3) target bundleno = 1802 (0x70a), region = 44 }
   0xa   : > { %s2054_s0 = sld [smem:[#allocation3_spill]] (!%p307_p3)  ;;  %p1588_p7 = scmp.ne.s32.totalorder (!%p307_p3), %s1797_s24, 0 }
  0x10   : > { %s377_s8 = scalar_select %p376_p5, %s1801_s25, 1 }
  0x11   : > { %s379_s9 = scalar_select %p378_p6, %s1797_s24, 1 }
  0x12   : > { %s1576_s10 = sshll.u32 %s377_s8, 1  ;;  %427 = sbr.rel (%p1588_p7) target bundleno = 25 (0x19), region = 48  ;;  %vm428_vm0 = vcmask (!%p1588_p7), 253952   ;;  %v1815_v0 = vmov (!%p1588_p7), 0.0  }
  0x13   : > { %s381_s11 = sadd.s32 %s1576_s10, %s379_s9  ;;  %429 = vst.msk [vmem:[#allocation2] sm:$0x1] (!%p1588_p7), %vm428_vm0, %v1815_v0 }
  0x14   : > { %s1897_s12 = sshll.u32 %s381_s11, 3 }
  0x15   : > { %s383_s15 = scalar_lea.vmem %s2054_s0, %s1897_s12  ;;  %s391_s18 = scalar_lea.vmem %s2046_s1, %s1897_s12 }
  0x16   : > { %s399_s21 = scalar_lea.vmem %s2047_s2, %s1897_s12  ;;  %s407_s8 = scalar_lea.vmem %s2048_s3, %s1897_s12 }
  0x17   : > { %s415_s11 = scalar_lea.vmem %s2051_s6, %s1897_s12  ;;  %s423_s0 = scalar_lea.vmem %s2052_s7, %s1897_s12 }
  0x19 PF: > { %v430_v1 = vld [vmem:[%s2049_s4] sm:$0xff]  ;;  %v431_v2 = vld [vmem:[%s2049_s4 + $0x8] sm:$0xff]  ;;  %v432_v3 = vld [vmem:[%s2049_s4 + $0x10] sm:$0xff]  ;;  %v1816_v4 = vmov 0.0|0.0   ;;  %vm1817_vm1 = vmmov 0   ;;  %v1818_v7 = vmov 0.0   ;;  %v904_v38 = vlaneseq }
  0x1a   : > { %1711 = vmatprep.subr.bf16.mxu0 %v1816_v4  ;;  %v1712_v5 = vpack.c.bf16 %v431_v2, %v430_v1  ;;  %v433_v6 = vld [vmem:[%s2049_s4 + $0x18] sm:$0xff]  ;;  %1647 = vmatprep.mubr.msk.f32.mxu0 %vm1817_vm1, %v1818_v7  ;;  %v435_v9 = vld [vmem:[%s383_s15] sm:$0xff]  ;;  %vm437_vm2 = vcmask 261120   ;;  %vm518_vm3 = vcmask 1043456   ;;  %vm514_vm4 = vcmask 31744  }
  0x1b   : > { %1650 = vmatprep.subr.mxu1 %v1818_v7  ;;  %1652 = vmatprep.mubr.msk.f32.mxu1 %vm1817_vm1, %v1818_v7  ;;  %v1715_v8 = vpack.c.bf16 %v433_v6, %v432_v3  ;;  %v436_v10 = vmul.f32 %v435_v9, %v435_v9  ;;  %v434_v11 = vld [vmem:[%s2050_s5] sm:$0xf]  ;;  %v907_v39 = vand.u32 127, %v904_v38  ;;  %v905_v40 = vshrl.u32 %v904_v38, 7 }
  0x1c   : > { %1713 = vmatpush3.bf16.msra.mxu0 %v1712_v5  ;;  %1651 = vmatpush3.msk.msra.mxu1 %vm518_vm3, %v434_v11  ;;  %v593_v16 = vld [vmem:[%s391_s18] sm:$0xff]  ;;  %vm914_vm9 = vcmask 64512   ;;  %v1366_v0 = vstv %s1801_s25  ;;  %vm1382_vm11 = vcmask 253952  }
  0x1d   : > { %1714 = vmatprep.subr.bf16.mxu0 %v1816_v4  ;;  %1717 = vmatprep.subr.bf16.mxu1 %v1816_v4  ;;  %v594_v17 = vmul.f32 %v593_v16, %v593_v16  ;;  %v746_v18 = vld [vmem:[%s407_s8] sm:$0xff]  ;;  %vm911_vm7 = vcmp.eq.s32.totalorder %v905_v40, %v907_v39  ;;  %vm908_vm8 = vcmp.gt.s32.totalorder %v905_v40, %v907_v39  ;;  %v1356_v62 = vsub.s32 0, %v905_v40 }
  0x1e   : > { %v1595_v19 = vmul.f32 -1.442695, %v746_v18  ;;  %v912_v43 = vsel %vm911_vm7, 1.0, %v1818_v7  ;;  %v745_v49 = vld [vmem:[%s399_s21] sm:$0xff]  ;;  %vm1367_vm10 = vcmp.le.s32.totalorder %v905_v40, %v1366_v0 }
  0x1f   : > { %v1207_v58 = vmul.f32 2.0, %v912_v43  ;;  %v1352_v63 = vld [vmem:[#allocation2] sm:$0x1] }
  0x20   : > { %1716 = vmatpush3.bf16.msra.mxu0 %v1715_v8  ;;  %v1357_v1 = vrot.slane %v1352_v63, %v1356_v62 }
  0x21   : > { %1666 = vmatprep.subr.mxu0 %v1818_v7 }
  0x23   : > { %1648 = vmatmul.mubr.msk.f32.vlgmr.msra.gmra.mrb[0].mxu0 %vm437_vm2, %v436_v10 }
  0x24   : > { %1668 = vmatprep.mubr.msk.f32.mxu0 %vm1817_vm1, %v1818_v7  ;;  %1667 = vmatpush3.msk.msra.mxu0 %vm518_vm3, %v434_v11 }
  0x25   : > { %1676 = vmatprep.subr.mxu0 %v1818_v7 }
  0xf6   : > { %v507_v12 = vpop.f32.mrb[0].mxu0 }
  0xf7   : > { %1767 = vrsqrt.f32 %v507_v12  ;;  %v1649_v13 = vpop.f32.mrb[1].mxu0  ;;  %vm511_vm5 = vcmp.gt.f32.partialorder %v507_v12, 0.0 }
  0xf8   : > { %1769 = vpow2.f32 %v1595_v19 }
 0x101   : > { %v1768_v14 = vpop.eup %1767 }
 0x102   : > { %v513_v15 = vsel %vm511_vm5, %v1768_v14, 0.0  ;;  %v1770_v20 = vpop.eup %1769 }
 0x103   : > { %1653 = vmatmul.mubr.msk.f32.vlgmr.msra.gmra.mrb[0].mxu1 %vm514_vm4, %v513_v15  ;;  %v750_v21 = vadd.f32 1.0, %v1770_v20 }
 0x104   : > { %1719 = vmatpush3.bf16.msra.mxu1 %v1712_v5  ;;  %1663 = vmatprep.mubr.msk.f32.mxu1 %vm1817_vm1, %v1818_v7 }
 0x105   : > { %1720 = vmatprep.subr.bf16.mxu1 %v1816_v4  ;;  %1771 = vrcp.f32 %v750_v21 }
 0x108   : > { %1722 = vmatpush3.bf16.msra.mxu1 %v1715_v8 }
 0x109   : > { %1671 = vmatprep.subr.mxu1 %v1818_v7 }
 0x10b   : > { %1664 = vmatmul.mubr.msk.f32.vlgmr.msra.gmra.mrb[2].mxu1 %vm437_vm2, %v594_v17 }
 0x10c   : > { %1672 = vmatpush3.msk.msra.mxu1 %vm518_vm3, %v434_v11  ;;  %1673 = vmatprep.mubr.msk.f32.mxu1 %vm1817_vm1, %v1818_v7 }
 0x10d   : > { %1681 = vmatprep.subr.mxu1 %v1818_v7 }
 0x10f   : > { %v1772_v22 = vpop.eup %1771 }
 0x110   : > { %1674 = vmatmul.mubr.msk.f32.vlgmr.msra.gmra.mrb[4].mxu1 %vm514_vm4, %v1772_v22 }
 0x111   : > { %1683 = vmatprep.mubr.msk.f32.mxu1 %vm1817_vm1, %v1818_v7 }
 0x1d6   : > { %v588_v23 = vpop.f32.mrb[0].mxu1 }
 0x1d7   : > { %v1654_v24 = vpop.f32.mrb[1].mxu1  ;;  %v1976_v32 = vmul.f32 %v588_v23, %v435_v9 }
 0x1d9   : > { %v1361_v10 = vmul.f32 %v1357_v1, %v1976_v32 }
 0x1de   : > { %v664_v25 = vpop.f32.mrb[2].mxu1 }
 0x1df   : > { %1773 = vrsqrt.f32 %v664_v25  ;;  %v1665_v26 = vpop.f32.mrb[3].mxu1  ;;  %vm668_vm6 = vcmp.gt.f32.partialorder %v664_v25, 0.0 }
 0x1e3   : > { %v822_v29 = vpop.f32.mrb[4].mxu1 }
 0x1e4   : > { %v1675_v30 = vpop.f32.mrb[5].mxu1  ;;  %v827_v55 = vmul.f32 %v822_v29, %v745_v49 }
 0x1e9   : > { %v1774_v27 = vpop.eup %1773 }
 0x1ea   : > { %v670_v28 = vsel %vm668_vm6, %v1774_v27, 0.0 }
 0x1eb   : > { %1669 = vmatmul.mubr.msk.f32.vlgmr.msra.gmra.mrb[2].mxu0 %vm514_vm4, %v670_v28 }
 0x1ec   : > { %1678 = vmatprep.mubr.msk.f32.mxu0 %vm1817_vm1, %v1818_v7 }
 0x2be   : > { %v740_v31 = vpop.f32.mrb[2].mxu0 }
 0x2bf   : > { %v1978_v33 = vmul.f32 %v740_v31, %v593_v16  ;;  %v1670_v34 = vpop.f32.mrb[3].mxu0 }
 0x2c1   : > { %v826_v35 = vmul.f32 %v822_v29, %v1978_v33  ;;  %1677 = vmatpush3.xpose.msk.msra.mxu0 %vm437_vm2, %v1978_v33  ;;  %v1362_v36 = vmul.f32 %v1978_v33, %v1976_v32 }
 0x2c2   : > { %1686 = vmatprep.subr.mxu0 %v1818_v7 }
 0x2c3   : > { %v1363_v37 = vsel %vm437_vm2, %v1362_v36, 0.0 }
 0x2c4   : > { %1679 = vmatmul.mubr.msk.f32.vlgmr.msra.gmra.mrb[4].mxu0 %vm437_vm2, %v826_v35  ;;  %1364 = vadd.xlane.f32.xlu0 %v1363_v37 }
 0x2c5   : > { %1688 = vmatprep.mubr.msk.f32.mxu0 %vm1817_vm1, %v1818_v7 }
 0x351   : > { %v1365_v2 = vpop.xlane.xlu0 %1364 }
 0x352   : > { %v1368_v9 = vsel %vm1367_vm10, %v1365_v2, 0.0 }
 0x397   : > { %v900_v41 = vpop.f32.mrb[4].mxu0 }
 0x398   : > { %v909_v42 = vsub.f32 0.0, %v900_v41  ;;  %v1680_v44 = vpop.f32.mrb[5].mxu0 }
 0x39a   : > { %v910_v45 = vsel %vm908_vm8, %v909_v42, 0.0  ;;  %1682 = vmatpush3.msk.msra.mxu1 %vm908_vm8, %v909_v42 }
 0x39b   : > { %v913_v46 = vadd.f32 %v912_v43, %v910_v45  ;;  %1684 = vmatmul.mubr.msk.f32.vlgmr.msra.gmra.mrb[6].mxu1 %vm914_vm9, %v910_v45  ;;  %1691 = vmatprep.subr.mxu1 %v1818_v7 }
 0x39c   : > { %1693 = vmatprep.mubr.msk.f32.mxu1 %vm1817_vm1, %v1818_v7 }
 0x39d   : > { %1687 = vmatpush3.msra.mxu0 %v913_v46 }
 0x39e   : > { %1696 = vmatprep.subr.mxu0 %v1818_v7 }
 0x46e   : > { %v984_v47 = vpop.f32.mrb[6].mxu1 }
 0x46f   : > { %v1685_v48 = vpop.f32.mrb[7].mxu1  ;;  %1689 = vmatmul.mubr.msk.f32.vlgmr.msra.gmra.mrb[6].mxu0 %vm914_vm9, %v984_v47  ;;  %1692 = vmatpush3.msra.mxu1 %v984_v47 }
 0x470   : > { %1694 = vmatmul.mubr.msk.f32.vlgmr.msra.gmra.mrb[8].mxu1 %vm914_vm9, %v984_v47  ;;  %1701 = vmatprep.subr.mxu1 %v1818_v7 }
 0x471   : > { %1702 = vmatpush3.msra.mxu1 %v826_v35  ;;  %1698 = vmatprep.mubr.msk.f32.mxu0 %vm1817_vm1, %v1818_v7 }
 0x472   : > { %1703 = vmatprep.mubr.msk.f32.mxu1 %vm1817_vm1, %v1818_v7 }
 0x542   : > { %v1057_v50 = vpop.f32.mrb[6].mxu0 }
 0x543   : > { %v1061_v51 = vadd.f32 %v1057_v50, %v913_v46  ;;  %v1690_v52 = vpop.f32.mrb[7].mxu0  ;;  %v1128_v53 = vpop.f32.mrb[8].mxu1 }
 0x544   : > { %v1695_v54 = vpop.f32.mrb[9].mxu1 }
 0x545   : > { %1697 = vmatpush3.msra.mxu0 %v1061_v51 }
 0x546   : > { %1699 = vmatmul.mubr.msk.f32.vlgmr.msra.gmra.mrb[8].mxu0 %vm914_vm9, %v1128_v53  ;;  %1706 = vmatprep.subr.mxu0 %v1818_v7 }
 0x547   : > { %1707 = vmatpush3.msra.mxu0 %v827_v55  ;;  %1708 = vmatprep.mubr.msk.f32.mxu0 %vm1817_vm1, %v1818_v7 }
 0x619   : > { %v1201_v56 = vpop.f32.mrb[8].mxu0 }
 0x61a   : > { %v1205_v57 = vadd.f32 %v1201_v56, %v1061_v51  ;;  %v1700_v59 = vpop.f32.mrb[9].mxu0 }
 0x61c   : > { %v1206_v60 = vmul.f32 3.0, %v1205_v57 }
 0x61e   : > { %v1208_v61 = vsub.f32 %v1206_v60, %v1207_v58 }
 0x620   : > { %1704 = vmatmul.mubr.msk.f32.vlgmr.msra.gmra.mrb[10].mxu1 %vm914_vm9, %v1208_v61  ;;  %1709 = vmatmul.mubr.msk.f32.vlgmr.msra.gmra.mrb[10].mxu0 %vm914_vm9, %v1208_v61 }
 0x6f3   : > { %v1278_v3 = vpop.f32.mrb[10].mxu1  ;;  %v1348_v4 = vpop.f32.mrb[10].mxu0 }
 0x6f4   : > { %v1359_v5 = vmul.f32 %v1357_v1, %v1278_v3  ;;  %v1705_v6 = vpop.f32.mrb[11].mxu1  ;;  %v1710_v7 = vpop.f32.mrb[11].mxu0 }
 0x6f6   : > { %v1360_v8 = vsub.f32 %v1348_v4, %v1359_v5 }
 0x6f8   : > { %v1369_v11 = vmul.f32 %v1368_v9, %v1360_v8  ;;  %1372 = vst.msk [vmem:[%s423_s0] sm:$0xff] %vm437_vm2, %v1360_v8  ;;  %v1373_v12 = vmul.f32 %v1360_v8, %v1978_v33 }
 0x6fa   : > { %v1370_v13 = vadd.f32 %v1369_v11, %v1361_v10  ;;  %v1374_v14 = vsel %vm437_vm2, %v1373_v12, 0.0 }
 0x6fb   : > { %v1375_v15 = vrot.slane %v1374_v14, 4 }
 0x6fc   : > { %1371 = vst.msk [vmem:[%s415_s11] sm:$0xff] %vm437_vm2, %v1370_v13 }
 0x6fd   : > { %v1376_v16 = vadd.f32 %v1375_v15, %v1374_v14 }
 0x6ff   : > { %v1377_v17 = vrot.slane %v1376_v16, 2 }
 0x701   : > { %v1378_v18 = vadd.f32 %v1377_v17, %v1376_v16 }
 0x703   : > { %v1379_v19 = vrot.slane %v1378_v18, 1 }
 0x705   : > { %v1380_v20 = vadd.f32 %v1379_v19, %v1378_v18 }
 0x707   : > { %v1381_v21 = vadd.f32 %v1380_v20, %v1352_v63 }
 0x709   : > { %1383 = vst.msk [vmem:[#allocation2] sm:$0x1] %vm1382_vm11, %v1381_v21 }
 0x70a PF: > { %s18_s28 = sadd.s32 1, %s1813_s28   ;;  %s2055_s24 = smov %s1805_s26 }
 0x70b   : > { %p15_p8 = scmp.ge.s32.totalorder %s18_s28, 6   ;;  %s2056_s25 = smov %s1809_s27 }
 0x70c   : > { %s2057_s26 = smov %s2060_s29  ;;  %s2058_s27 = smov %s2064_s30 }
 0x70d   :  { %17 = sbr.rel (!%p15_p8) target bundleno = 3 (0x3), region = 99 }

// kernel: deltanet_block_forward.13
= control target key start
LH: loop header
LB: loop body
LE: loop exit
PB: predicated region body
PF: predicated region fallthrough
CT: control target
= control target key end

     0   :  { %vm22_vm0 = vcmask 261120   ;;  %v210_v22 = vmov 0.0   ;;  %s312_s0 = inlined_call_operand.vmem [shape: f32[32,32], index: 0, kind: input, shape index: {}]   ;;  %s313_s2 = inlined_call_operand.vmem [shape: f32[32,256], index: 2, kind: input, shape index: {}]   ;;  %s314_s1 = inlined_call_operand.vmem [shape: f32[1,32], index: 1, kind: input, shape index: {}]   ;;  %s315_s3 = inlined_call_operand.vmem [shape: f32[32,256], index: 3, kind: output, shape index: {}]  }
   0x1   :  { %v14_v0 = vld [vmem:[%s312_s0] sm:$0xff]  ;;  %v15_v1 = vld [vmem:[%s312_s0 + $0x8] sm:$0xff]  ;;  %v240_v2 = vld [vmem:[%s312_s0 + $0x10] sm:$0xff]  ;;  %147 = vmatprep.mubr.f32.mxu0 %v210_v22  ;;  %159 = vmatprep.mubr.f32.mxu1 %v210_v22 }
   0x2   :  { %v18_v3 = vmul.f32 %v14_v0, %v14_v0  ;;  %v19_v4 = vmul.f32 %v15_v1, %v15_v1  ;;  %v20_v5 = vmul.f32 %v240_v2, %v240_v2  ;;  %v247_v6 = vld [vmem:[%s312_s0 + $0x18] sm:$0xff]  ;;  %v64_v12 = vld [vmem:[%s313_s2 + $0x8] sm:$0xff]  ;;  %v63_v15 = vld [vmem:[%s313_s2] sm:$0xff] }
   0x3   :  { %v21_v7 = vmul.f32 %v247_v6, %v247_v6  ;;  %v66_v13 = vld [vmem:[%s313_s2 + $0x18] sm:$0xff]  ;;  %v65_v16 = vld [vmem:[%s313_s2 + $0x10] sm:$0xff]  ;;  %v68_v17 = vld [vmem:[%s313_s2 + $0x28] sm:$0xff] }
   0x4   :  { %v23_v8 = vsel %vm22_vm0, %v18_v3, 0.0  ;;  %v26_v9 = vsel %vm22_vm0, %v19_v4, 0.0  ;;  %v29_v10 = vsel %vm22_vm0, %v20_v5, 0.0  ;;  %v189_v14 = vpack.c.bf16 %v66_v13, %v64_v12  ;;  %v70_v19 = vld [vmem:[%s313_s2 + $0x38] sm:$0xff]  ;;  %v67_v20 = vld [vmem:[%s313_s2 + $0x20] sm:$0xff]  ;;  %v69_v21 = vld [vmem:[%s313_s2 + $0x30] sm:$0xff] }
   0x5   :  { %24 = vadd.xlane.f32.xlu0 %v23_v8  ;;  %27 = vadd.xlane.f32.xlu1 %v26_v9  ;;  %v32_v11 = vsel %vm22_vm0, %v21_v7, 0.0  ;;  %v191_v18 = vpack.c.bf16 %v65_v16, %v63_v15  ;;  %v193_v23 = vpack.c.bf16 %v70_v19, %v68_v17  ;;  %v195_v24 = vpack.c.bf16 %v69_v21, %v67_v20  ;;  %v184_v38 = vld [vmem:[%s314_s1] ss:$0 sm:$0xff] }
   0x6   :  { %190 = vmatprep.subr.bf16.mxu0 %v189_v14  ;;  %197 = vmatprep.subr.bf16.mxu1 %v189_v14 }
   0x7   :  { %192 = vmatpush1.bf16.msra.mxu0 %v191_v18  ;;  %199 = vmatpush1.bf16.msra.mxu1 %v191_v18 }
   0x8   :  { %194 = vmatprep.subr.bf16.mxu0 %v193_v23  ;;  %198 = vmatprep.subr.bf16.mxu1 %v193_v23 }
   0x9   :  { %30 = vadd.xlane.f32.xlu0 %v29_v10  ;;  %33 = vadd.xlane.f32.xlu1 %v32_v11 }
   0xb   :  { %196 = vmatpush1.bf16.msra.mxu0 %v195_v24  ;;  %200 = vmatpush1.bf16.msra.mxu1 %v195_v24 }
  0x92   :  { %v25_v25 = vpop.xlane.xlu0 %24  ;;  %v28_v26 = vpop.xlane.xlu1 %27 }
  0x93   :  { %v36_v27 = vmul.f32 0.03125, %v25_v25  ;;  %v37_v28 = vmul.f32 0.03125, %v28_v26 }
  0x95   :  { %v40_v29 = vadd.f32 1e-06, %v36_v27  ;;  %v41_v30 = vadd.f32 1e-06, %v37_v28 }
  0x96   :  { %v31_v31 = vpop.xlane.xlu0 %30  ;;  %v34_v32 = vpop.xlane.xlu1 %33 }
  0x97   :  { %202 = vrsqrt.f32 %v40_v29  ;;  %v38_v33 = vmul.f32 0.03125, %v31_v31  ;;  %v39_v34 = vmul.f32 0.03125, %v34_v32 }
  0x98   :  { %204 = vrsqrt.f32 %v41_v30 }
  0x99   :  { %v42_v35 = vadd.f32 1e-06, %v38_v33  ;;  %v43_v36 = vadd.f32 1e-06, %v39_v34 }
  0x9b   :  { %206 = vrsqrt.f32 %v42_v35 }
  0x9c   :  { %208 = vrsqrt.f32 %v43_v36 }
  0xa1   :  { %v203_v37 = vpop.eup %202 }
  0xa2   :  { %v205_v39 = vpop.eup %204  ;;  %v48_v40 = vmul.f32 %v203_v37, %v14_v0 }
  0xa3   :  { %v49_v41 = vmul.f32 %v205_v39, %v15_v1 }
  0xa4   :  { %v59_v42 = vmul.f32 %v184_v38, %v48_v40 }
  0xa5   :  { %v207_v43 = vpop.eup %206  ;;  %v60_v45 = vmul.f32 %v184_v38, %v49_v41 }
  0xa6   :  { %v209_v44 = vpop.eup %208  ;;  %185 = vmatmul.mubr.msk.f32.vlgmr.msra.gmra.mrb[0].mxu0 %vm22_vm0, %v59_v42  ;;  %v50_v46 = vmul.f32 %v207_v43, %v240_v2 }
  0xa7   :  { %153 = vmatprep.mubr.f32.mxu0 %v210_v22  ;;  %v51_v47 = vmul.f32 %v209_v44, %v247_v6 }
  0xa8   :  { %v61_v48 = vmul.f32 %v184_v38, %v50_v46 }
  0xa9   :  { %v62_v49 = vmul.f32 %v184_v38, %v51_v47 }
  0xaa   :  { %186 = vmatmul.mubr.msk.f32.gmra.mrb[2].mxu0 %vm22_vm0, %v60_v45  ;;  %187 = vmatmul.mubr.msk.f32.vlgmr.msra.gmra.mrb[0].mxu1 %vm22_vm0, %v61_v48 }
  0xab   :  { %165 = vmatprep.mubr.f32.mxu1 %v210_v22 }
  0xae   :  { %188 = vmatmul.mubr.msk.f32.gmra.mrb[2].mxu1 %vm22_vm0, %v62_v49 }
 0x179   :  { %v149_v50 = vpop.f32.mrb[0].mxu0 }
 0x17a   :  { %172 = vst [vmem:[%s315_s3] sm:$0xff] %v149_v50  ;;  %v151_v51 = vpop.f32.mrb[1].mxu0 }
 0x17b   :  { %173 = vst [vmem:[%s315_s3 + $0x8] sm:$0xff] %v151_v51 }
 0x17d   :  { %v155_v52 = vpop.f32.mrb[2].mxu0  ;;  %v161_v53 = vpop.f32.mrb[0].mxu1 }
 0x17e   :  { %174 = vst [vmem:[%s315_s3 + $0x10] sm:$0xff] %v155_v52  ;;  %176 = vst [vmem:[%s315_s3 + $0x20] sm:$0xff] %v161_v53  ;;  %v157_v54 = vpop.f32.mrb[3].mxu0  ;;  %v163_v55 = vpop.f32.mrb[1].mxu1 }
 0x17f   :  { %175 = vst [vmem:[%s315_s3 + $0x18] sm:$0xff] %v157_v54  ;;  %177 = vst [vmem:[%s315_s3 + $0x28] sm:$0xff] %v163_v55 }
 0x181   :  { %v167_v56 = vpop.f32.mrb[2].mxu1 }
 0x182   :  { %178 = vst [vmem:[%s315_s3 + $0x30] sm:$0xff] %v167_v56  ;;  %v169_v57 = vpop.f32.mrb[3].mxu1 }
 0x183   :  { %179 = vst [vmem:[%s315_s3 + $0x38] sm:$0xff] %v169_v57 }

// kernel: deltanet_block_forward.14
= control target key start
LH: loop header
LB: loop body
LE: loop exit
PB: predicated region body
PF: predicated region fallthrough
CT: control target
= control target key end

     0   :  { %s1024_s1 = inlined_call_operand.vmem [shape: f32[256,256], index: 1, kind: input, shape index: {}]   ;;  %s1025_s2 = inlined_call_operand.vmem [shape: f32[256,256], index: 2, kind: input, shape index: {}]   ;;  %s1026_s0 = inlined_call_operand.vmem [shape: f32[32,256], index: 0, kind: input, shape index: {}]   ;;  %s1027_s3 = inlined_call_operand.vmem [shape: f32[32,256], index: 3, kind: output, shape index: {}]  }
   0x1   :  { %v23_v0 = vld [vmem:[%s1024_s1 + $0x8] sm:$0xff]  ;;  %v25_v1 = vld [vmem:[%s1024_s1 + $0x18] sm:$0xff]  ;;  %v22_v2 = vld [vmem:[%s1024_s1] sm:$0xff] }
   0x2   :  { %v412_v3 = vpack.c.bf16 %v25_v1, %v23_v0  ;;  %v24_v4 = vld [vmem:[%s1024_s1 + $0x10] sm:$0xff]  ;;  %v27_v5 = vld [vmem:[%s1024_s1 + $0x28] sm:$0xff]  ;;  %v29_v6 = vld [vmem:[%s1024_s1 + $0x38] sm:$0xff] }
   0x3   :  { %v414_v7 = vpack.c.bf16 %v24_v4, %v22_v2  ;;  %v416_v8 = vpack.c.bf16 %v29_v6, %v27_v5  ;;  %v26_v9 = vld [vmem:[%s1024_s1 + $0x20] sm:$0xff]  ;;  %v28_v10 = vld [vmem:[%s1024_s1 + $0x30] sm:$0xff]  ;;  %v31_v11 = vld [vmem:[%s1024_s1 + $0x48] sm:$0xff] }
   0x4   :  { %413 = vmatprep.subr.bf16.mxu0 %v412_v3  ;;  %v33_v12 = vld [vmem:[%s1024_s1 + $0x58] sm:$0xff]  ;;  %v418_v13 = vpack.c.bf16 %v28_v10, %v26_v9  ;;  %v30_v15 = vld [vmem:[%s1024_s1 + $0x40] sm:$0xff]  ;;  %v32_v16 = vld [vmem:[%s1024_s1 + $0x50] sm:$0xff] }
   0x5   :  { %415 = vmatpush1.bf16.msra.mxu0 %v414_v7  ;;  %v420_v14 = vpack.c.bf16 %v33_v12, %v31_v11  ;;  %v35_v17 = vld [vmem:[%s1024_s1 + $0x68] sm:$0xff]  ;;  %v37_v18 = vld [vmem:[%s1024_s1 + $0x78] sm:$0xff]  ;;  %v422_v19 = vpack.c.bf16 %v32_v16, %v30_v15  ;;  %v34_v20 = vld [vmem:[%s1024_s1 + $0x60] sm:$0xff] }
   0x6   :  { %417 = vmatprep.subr.bf16.mxu0 %v416_v8  ;;  %v424_v21 = vpack.c.bf16 %v37_v18, %v35_v17  ;;  %v36_v22 = vld [vmem:[%s1024_s1 + $0x70] sm:$0xff]  ;;  %v176_v23 = vld [vmem:[%s1025_s2 + $0x8] sm:$0xff]  ;;  %v178_v24 = vld [vmem:[%s1025_s2 + $0x18] sm:$0xff] }
   0x7   :  { %v39_v25 = vld [vmem:[%s1024_s1 + $0x88] sm:$0xff]  ;;  %v41_v26 = vld [vmem:[%s1024_s1 + $0x98] sm:$0xff]  ;;  %v476_v27 = vpack.c.bf16 %v178_v24, %v176_v23  ;;  %v175_v28 = vld [vmem:[%s1025_s2] sm:$0xff]  ;;  %v426_v30 = vpack.c.bf16 %v36_v22, %v34_v20 }
   0x8   :  { %v177_v29 = vld [vmem:[%s1025_s2 + $0x10] sm:$0xff]  ;;  %v38_v31 = vld [vmem:[%s1024_s1 + $0x80] sm:$0xff]  ;;  %v180_v33 = vld [vmem:[%s1025_s2 + $0x28] sm:$0xff]  ;;  %v428_v35 = vpack.c.bf16 %v41_v26, %v39_v25 }
   0x9   :  { %419 = vmatpush1.bf16.msra.mxu0 %v418_v13  ;;  %477 = vmatprep.subr.bf16.mxu1 %v476_v27  ;;  %v478_v32 = vpack.c.bf16 %v177_v29, %v175_v28  ;;  %v182_v34 = vld [vmem:[%s1025_s2 + $0x38] sm:$0xff]  ;;  %v40_v36 = vld [vmem:[%s1024_s1 + $0x90] sm:$0xff]  ;;  %v179_v38 = vld [vmem:[%s1025_s2 + $0x20] sm:$0xff] }
   0xa   :  { %421 = vmatprep.subr.bf16.mxu0 %v420_v14  ;;  %v480_v37 = vpack.c.bf16 %v182_v34, %v180_v33  ;;  %v181_v39 = vld [vmem:[%s1025_s2 + $0x30] sm:$0xff]  ;;  %v43_v40 = vld [vmem:[%s1024_s1 + $0xa8] sm:$0xff]  ;;  %v45_v41 = vld [vmem:[%s1024_s1 + $0xb8] sm:$0xff]  ;;  %v430_v45 = vpack.c.bf16 %v40_v36, %v38_v31 }
   0xb   :  { %479 = vmatpush1.bf16.msra.mxu1 %v478_v32  ;;  %v482_v42 = vpack.c.bf16 %v181_v39, %v179_v38  ;;  %v184_v43 = vld [vmem:[%s1025_s2 + $0x48] sm:$0xff]  ;;  %v186_v44 = vld [vmem:[%s1025_s2 + $0x58] sm:$0xff]  ;;  %v42_v46 = vld [vmem:[%s1024_s1 + $0xa0] sm:$0xff]  ;;  %v432_v50 = vpack.c.bf16 %v45_v41, %v43_v40 }
   0xc   :  { %481 = vmatprep.subr.bf16.mxu1 %v480_v37  ;;  %v484_v47 = vpack.c.bf16 %v186_v44, %v184_v43  ;;  %v183_v48 = vld [vmem:[%s1025_s2 + $0x40] sm:$0xff]  ;;  %v185_v49 = vld [vmem:[%s1025_s2 + $0x50] sm:$0xff]  ;;  %v188_v52 = vld [vmem:[%s1025_s2 + $0x68] sm:$0xff] }
   0xd   :  { %423 = vmatpush1.bf16.msra.mxu0 %v422_v19  ;;  %v44_v51 = vld [vmem:[%s1024_s1 + $0xb0] sm:$0xff]  ;;  %v190_v53 = vld [vmem:[%s1025_s2 + $0x78] sm:$0xff]  ;;  %v47_v54 = vld [vmem:[%s1024_s1 + $0xc8] sm:$0xff]  ;;  %v486_v56 = vpack.c.bf16 %v185_v49, %v183_v48 }
   0xe   :  { %425 = vmatprep.subr.bf16.mxu0 %v424_v21  ;;  %v49_v55 = vld [vmem:[%s1024_s1 + $0xd8] sm:$0xff]  ;;  %v488_v57 = vpack.c.bf16 %v190_v53, %v188_v52  ;;  %v187_v58 = vld [vmem:[%s1025_s2 + $0x60] sm:$0xff]  ;;  %v189_v59 = vld [vmem:[%s1025_s2 + $0x70] sm:$0xff]  ;;  %v434_v60 = vpack.c.bf16 %v44_v51, %v42_v46 }
   0xf   :  { %483 = vmatpush1.bf16.msra.mxu1 %v482_v42  ;;  %v192_v61 = vld [vmem:[%s1025_s2 + $0x88] sm:$0xff]  ;;  %v194_v62 = vld [vmem:[%s1025_s2 + $0x98] sm:$0xff]  ;;  %v436_v63 = vpack.c.bf16 %v49_v55, %v47_v54  ;;  %v46_v0 = vld [vmem:[%s1024_s1 + $0xc0] sm:$0xff]  ;;  %v490_v4 = vpack.c.bf16 %v189_v59, %v187_v58 }
  0x10   :  { %485 = vmatprep.subr.bf16.mxu1 %v484_v47  ;;  %v48_v1 = vld [vmem:[%s1024_s1 + $0xd0] sm:$0xff]  ;;  %v51_v2 = vld [vmem:[%s1024_s1 + $0xe8] sm:$0xff]  ;;  %v53_v3 = vld [vmem:[%s1024_s1 + $0xf8] sm:$0xff]  ;;  %v492_v5 = vpack.c.bf16 %v194_v62, %v192_v61 }
  0x11   :  { %427 = vmatpush1.bf16.msra.mxu0 %v426_v30  ;;  %v191_v6 = vld [vmem:[%s1025_s2 + $0x80] sm:$0xff]  ;;  %v193_v7 = vld [vmem:[%s1025_s2 + $0x90] sm:$0xff]  ;;  %v438_v8 = vpack.c.bf16 %v48_v1, %v46_v0  ;;  %v196_v9 = vld [vmem:[%s1025_s2 + $0xa8] sm:$0xff]  ;;  %v440_v11 = vpack.c.bf16 %v53_v3, %v51_v2 }
  0x12   :  { %429 = vmatprep.subr.bf16.mxu0 %v428_v35  ;;  %v198_v10 = vld [vmem:[%s1025_s2 + $0xb8] sm:$0xff]  ;;  %v50_v12 = vld [vmem:[%s1024_s1 + $0xe0] sm:$0xff]  ;;  %v52_v13 = vld [vmem:[%s1024_s1 + $0xf0] sm:$0xff]  ;;  %v494_v16 = vpack.c.bf16 %v193_v7, %v191_v6 }
  0x13   :  { %487 = vmatpush1.bf16.msra.mxu1 %v486_v56  ;;  %v55_v14 = vld [vmem:[%s1024_s1 + $0x108] sm:$0xff]  ;;  %v57_v15 = vld [vmem:[%s1024_s1 + $0x118] sm:$0xff]  ;;  %v496_v17 = vpack.c.bf16 %v198_v10, %v196_v9  ;;  %v195_v18 = vld [vmem:[%s1025_s2 + $0xa0] sm:$0xff]  ;;  %v442_v20 = vpack.c.bf16 %v52_v13, %v50_v12 }
  0x14   :  { %489 = vmatprep.subr.bf16.mxu1 %v488_v57  ;;  %v197_v19 = vld [vmem:[%s1025_s2 + $0xb0] sm:$0xff]  ;;  %v200_v21 = vld [vmem:[%s1025_s2 + $0xc8] sm:$0xff]  ;;  %v202_v22 = vld [vmem:[%s1025_s2 + $0xd8] sm:$0xff]  ;;  %v444_v23 = vpack.c.bf16 %v57_v15, %v55_v14 }
  0x15   :  { %431 = vmatpush1.bf16.msra.mxu0 %v430_v45  ;;  %v54_v24 = vld [vmem:[%s1024_s1 + $0x100] sm:$0xff]  ;;  %v56_v25 = vld [vmem:[%s1024_s1 + $0x110] sm:$0xff]  ;;  %v59_v26 = vld [vmem:[%s1024_s1 + $0x128] sm:$0xff]  ;;  %v498_v28 = vpack.c.bf16 %v197_v19, %v195_v18  ;;  %v500_v29 = vpack.c.bf16 %v202_v22, %v200_v21 }
  0x16   :  { %433 = vmatprep.subr.bf16.mxu0 %v432_v50  ;;  %v61_v27 = vld [vmem:[%s1024_s1 + $0x138] sm:$0xff]  ;;  %v199_v30 = vld [vmem:[%s1025_s2 + $0xc0] sm:$0xff]  ;;  %v201_v31 = vld [vmem:[%s1025_s2 + $0xd0] sm:$0xff]  ;;  %v446_v32 = vpack.c.bf16 %v56_v25, %v54_v24 }
  0x17   :  { %491 = vmatpush1.bf16.msra.mxu1 %v490_v4  ;;  %v204_v33 = vld [vmem:[%s1025_s2 + $0xe8] sm:$0xff]  ;;  %v206_v34 = vld [vmem:[%s1025_s2 + $0xf8] sm:$0xff]  ;;  %v448_v35 = vpack.c.bf16 %v61_v27, %v59_v26  ;;  %v58_v36 = vld [vmem:[%s1024_s1 + $0x120] sm:$0xff]  ;;  %v502_v41 = vpack.c.bf16 %v201_v31, %v199_v30 }
  0x18   :  { %493 = vmatprep.subr.bf16.mxu1 %v492_v5  ;;  %v60_v37 = vld [vmem:[%s1024_s1 + $0x130] sm:$0xff]  ;;  %v15_v38 = vld [vmem:[%s1026_s0 + $0x8] sm:$0xff]  ;;  %v65_v40 = vld [vmem:[%s1024_s1 + $0x158] sm:$0xff]  ;;  %v504_v42 = vpack.c.bf16 %v206_v34, %v204_v33 }
  0x19   :  { %435 = vmatpush1.bf16.msra.mxu0 %v434_v60  ;;  %v63_v39 = vld [vmem:[%s1024_s1 + $0x148] sm:$0xff]  ;;  %150 = vmatprep.mubr.f32.mxu0 %v15_v38  ;;  %v203_v43 = vld [vmem:[%s1025_s2 + $0xe0] sm:$0xff]  ;;  %v205_v44 = vld [vmem:[%s1025_s2 + $0xf0] sm:$0xff]  ;;  %v450_v45 = vpack.c.bf16 %v60_v37, %v58_v36 }
  0x1a   :  { %437 = vmatprep.subr.bf16.mxu0 %v436_v63  ;;  %303 = vmatprep.mubr.f32.mxu1 %v15_v38  ;;  %v208_v46 = vld [vmem:[%s1025_s2 + $0x108] sm:$0xff]  ;;  %v210_v47 = vld [vmem:[%s1025_s2 + $0x118] sm:$0xff]  ;;  %v452_v48 = vpack.c.bf16 %v65_v40, %v63_v39  ;;  %v62_v49 = vld [vmem:[%s1024_s1 + $0x140] sm:$0xff]  ;;  %v506_v53 = vpack.c.bf16 %v205_v44, %v203_v43 }
  0x1b   :  { %495 = vmatpush1.bf16.msra.mxu1 %v494_v16  ;;  %v64_v50 = vld [vmem:[%s1024_s1 + $0x150] sm:$0xff]  ;;  %v67_v51 = vld [vmem:[%s1024_s1 + $0x168] sm:$0xff]  ;;  %v69_v52 = vld [vmem:[%s1024_s1 + $0x178] sm:$0xff]  ;;  %v508_v54 = vpack.c.bf16 %v210_v47, %v208_v46 }
  0x1c   :  { %497 = vmatprep.subr.bf16.mxu1 %v496_v17  ;;  %v207_v55 = vld [vmem:[%s1025_s2 + $0x100] sm:$0xff]  ;;  %v209_v56 = vld [vmem:[%s1025_s2 + $0x110] sm:$0xff]  ;;  %v454_v57 = vpack.c.bf16 %v64_v50, %v62_v49  ;;  %v212_v58 = vld [vmem:[%s1025_s2 + $0x128] sm:$0xff]  ;;  %v456_v60 = vpack.c.bf16 %v69_v52, %v67_v51 }
  0x1d   :  { %439 = vmatpush1.bf16.msra.mxu0 %v438_v8  ;;  %v214_v59 = vld [vmem:[%s1025_s2 + $0x138] sm:$0xff]  ;;  %v66_v61 = vld [vmem:[%s1024_s1 + $0x160] sm:$0xff]  ;;  %v68_v62 = vld [vmem:[%s1024_s1 + $0x170] sm:$0xff]  ;;  %v510_v1 = vpack.c.bf16 %v209_v56, %v207_v55 }
  0x1e   :  { %441 = vmatprep.subr.bf16.mxu0 %v440_v11  ;;  %v71_v63 = vld [vmem:[%s1024_s1 + $0x188] sm:$0xff]  ;;  %v73_v0 = vld [vmem:[%s1024_s1 + $0x198] sm:$0xff]  ;;  %v512_v2 = vpack.c.bf16 %v214_v59, %v212_v58  ;;  %v211_v3 = vld [vmem:[%s1025_s2 + $0x120] sm:$0xff]  ;;  %v458_v5 = vpack.c.bf16 %v68_v62, %v66_v61 }
  0x1f   :  { %499 = vmatpush1.bf16.msra.mxu1 %v498_v28  ;;  %v213_v4 = vld [vmem:[%s1025_s2 + $0x130] sm:$0xff]  ;;  %v216_v6 = vld [vmem:[%s1025_s2 + $0x148] sm:$0xff]  ;;  %v218_v7 = vld [vmem:[%s1025_s2 + $0x158] sm:$0xff]  ;;  %v460_v8 = vpack.c.bf16 %v73_v0, %v71_v63 }
  0x20   :  { %501 = vmatprep.subr.bf16.mxu1 %v500_v29  ;;  %v70_v9 = vld [vmem:[%s1024_s1 + $0x180] sm:$0xff]  ;;  %v72_v10 = vld [vmem:[%s1024_s1 + $0x190] sm:$0xff]  ;;  %v75_v11 = vld [vmem:[%s1024_s1 + $0x1a8] sm:$0xff]  ;;  %v514_v13 = vpack.c.bf16 %v213_v4, %v211_v3  ;;  %v516_v14 = vpack.c.bf16 %v218_v7, %v216_v6 }
  0x21   :  { %443 = vmatpush1.bf16.msra.mxu0 %v442_v20  ;;  %v77_v12 = vld [vmem:[%s1024_s1 + $0x1b8] sm:$0xff]  ;;  %v215_v15 = vld [vmem:[%s1025_s2 + $0x140] sm:$0xff]  ;;  %v217_v16 = vld [vmem:[%s1025_s2 + $0x150] sm:$0xff]  ;;  %v462_v17 = vpack.c.bf16 %v72_v10, %v70_v9 }
  0x22   :  { %445 = vmatprep.subr.bf16.mxu0 %v444_v23  ;;  %v220_v18 = vld [vmem:[%s1025_s2 + $0x168] sm:$0xff]  ;;  %v222_v19 = vld [vmem:[%s1025_s2 + $0x178] sm:$0xff]  ;;  %v464_v20 = vpack.c.bf16 %v77_v12, %v75_v11  ;;  %v74_v21 = vld [vmem:[%s1024_s1 + $0x1a0] sm:$0xff]  ;;  %v518_v25 = vpack.c.bf16 %v217_v16, %v215_v15 }
  0x23   :  { %503 = vmatpush1.bf16.msra.mxu1 %v502_v41  ;;  %v76_v22 = vld [vmem:[%s1024_s1 + $0x1b0] sm:$0xff]  ;;  %v79_v23 = vld [vmem:[%s1024_s1 + $0x1c8] sm:$0xff]  ;;  %v81_v24 = vld [vmem:[%s1024_s1 + $0x1d8] sm:$0xff]  ;;  %v520_v26 = vpack.c.bf16 %v222_v19, %v220_v18 }
  0x24   :  { %505 = vmatprep.subr.bf16.mxu1 %v504_v42  ;;  %v219_v27 = vld [vmem:[%s1025_s2 + $0x160] sm:$0xff]  ;;  %v221_v28 = vld [vmem:[%s1025_s2 + $0x170] sm:$0xff]  ;;  %v466_v29 = vpack.c.bf16 %v76_v22, %v74_v21  ;;  %v224_v30 = vld [vmem:[%s1025_s2 + $0x188] sm:$0xff] }
  0x25   :  { %447 = vmatpush1.bf16.msra.mxu0 %v446_v32  ;;  %v226_v31 = vld [vmem:[%s1025_s2 + $0x198] sm:$0xff]  ;;  %v468_v32 = vpack.c.bf16 %v81_v24, %v79_v23  ;;  %v78_v33 = vld [vmem:[%s1024_s1 + $0x1c0] sm:$0xff]  ;;  %v80_v34 = vld [vmem:[%s1024_s1 + $0x1d0] sm:$0xff]  ;;  %v522_v37 = vpack.c.bf16 %v221_v28, %v219_v27 }
  0x26   :  { %449 = vmatprep.subr.bf16.mxu0 %v448_v35  ;;  %v83_v35 = vld [vmem:[%s1024_s1 + $0x1e8] sm:$0xff]  ;;  %v85_v36 = vld [vmem:[%s1024_s1 + $0x1f8] sm:$0xff]  ;;  %v524_v38 = vpack.c.bf16 %v226_v31, %v224_v30  ;;  %v223_v39 = vld [vmem:[%s1025_s2 + $0x180] sm:$0xff]  ;;  %v470_v41 = vpack.c.bf16 %v80_v34, %v78_v33 }
  0x27   :  { %507 = vmatpush1.bf16.msra.mxu1 %v506_v53  ;;  %v225_v40 = vld [vmem:[%s1025_s2 + $0x190] sm:$0xff]  ;;  %v228_v42 = vld [vmem:[%s1025_s2 + $0x1a8] sm:$0xff]  ;;  %v230_v43 = vld [vmem:[%s1025_s2 + $0x1b8] sm:$0xff]  ;;  %v472_v44 = vpack.c.bf16 %v85_v36, %v83_v35 }
  0x28   :  { %509 = vmatprep.subr.bf16.mxu1 %v508_v54  ;;  %v84_v46 = vld [vmem:[%s1024_s1 + $0x1f0] sm:$0xff]  ;;  %v526_v47 = vpack.c.bf16 %v225_v40, %v223_v39  ;;  %v227_v49 = vld [vmem:[%s1025_s2 + $0x1a0] sm:$0xff]  ;;  %v232_v52 = vld [vmem:[%s1025_s2 + $0x1c8] sm:$0xff] }
  0x29   :  { %451 = vmatpush1.bf16.msra.mxu0 %v450_v45  ;;  %v82_v45 = vld [vmem:[%s1024_s1 + $0x1e0] sm:$0xff]  ;;  %v229_v50 = vld [vmem:[%s1025_s2 + $0x1b0] sm:$0xff]  ;;  %v234_v53 = vld [vmem:[%s1025_s2 + $0x1d8] sm:$0xff] }
  0x2a   :  { %453 = vmatprep.subr.bf16.mxu0 %v452_v48  ;;  %v528_v48 = vpack.c.bf16 %v230_v43, %v228_v42  ;;  %v474_v51 = vpack.c.bf16 %v84_v46, %v82_v45  ;;  %v530_v54 = vpack.c.bf16 %v229_v50, %v227_v49  ;;  %v532_v55 = vpack.c.bf16 %v234_v53, %v232_v52  ;;  %v231_v56 = vld [vmem:[%s1025_s2 + $0x1c0] sm:$0xff]  ;;  %v236_v59 = vld [vmem:[%s1025_s2 + $0x1e8] sm:$0xff]  ;;  %v17_v61 = vld [vmem:[%s1026_s0 + $0x18] sm:$0xff] }
  0x2b   :  { %511 = vmatpush1.bf16.msra.mxu1 %v510_v1  ;;  %v14_v58 = vld [vmem:[%s1026_s0] sm:$0xff]  ;;  %v237_v1 = vld [vmem:[%s1025_s2 + $0x1f0] sm:$0xff]  ;;  %v19_v3 = vld [vmem:[%s1026_s0 + $0x28] sm:$0xff] }
  0x2c   :  { %513 = vmatprep.subr.bf16.mxu1 %v512_v2  ;;  %v235_v0 = vld [vmem:[%s1025_s2 + $0x1e0] sm:$0xff]  ;;  %v16_v2 = vld [vmem:[%s1026_s0 + $0x10] sm:$0xff]  ;;  %v21_v6 = vld [vmem:[%s1026_s0 + $0x38] sm:$0xff] }
  0x2d   :  { %455 = vmatpush1.bf16.msra.mxu0 %v454_v57  ;;  %v233_v57 = vld [vmem:[%s1025_s2 + $0x1d0] sm:$0xff]  ;;  %v538_v4 = vpack.c.bf16 %v237_v1, %v235_v0 }
  0x2e   :  { %457 = vmatprep.subr.bf16.mxu0 %v456_v60  ;;  %v238_v60 = vld [vmem:[%s1025_s2 + $0x1f8] sm:$0xff]  ;;  %v534_v62 = vpack.c.bf16 %v233_v57, %v231_v56  ;;  %v20_v7 = vld [vmem:[%s1026_s0 + $0x30] sm:$0xff] }
  0x2f   :  { %515 = vmatpush1.bf16.msra.mxu1 %v514_v13  ;;  %v536_v63 = vpack.c.bf16 %v238_v60, %v236_v59 }
  0x30   :  { %517 = vmatprep.subr.bf16.mxu1 %v516_v14 }
  0x31   :  { %459 = vmatpush1.bf16.msra.mxu0 %v458_v5  ;;  %v18_v5 = vld [vmem:[%s1026_s0 + $0x20] sm:$0xff] }
  0x32   :  { %461 = vmatprep.subr.bf16.mxu0 %v460_v8 }
  0x33   :  { %519 = vmatpush1.bf16.msra.mxu1 %v518_v25 }
  0x34   :  { %521 = vmatprep.subr.bf16.mxu1 %v520_v26 }
  0x35   :  { %463 = vmatpush1.bf16.msra.mxu0 %v462_v17 }
  0x36   :  { %465 = vmatprep.subr.bf16.mxu0 %v464_v20 }
  0x37   :  { %523 = vmatpush1.bf16.msra.mxu1 %v522_v37 }
  0x38   :  { %525 = vmatprep.subr.bf16.mxu1 %v524_v38 }
  0x39   :  { %467 = vmatpush1.bf16.msra.mxu0 %v466_v29 }
  0x3a   :  { %469 = vmatprep.subr.bf16.mxu0 %v468_v32 }
  0x3b   :  { %527 = vmatpush1.bf16.msra.mxu1 %v526_v47 }
  0x3c   :  { %529 = vmatprep.subr.bf16.mxu1 %v528_v48 }
  0x3d   :  { %471 = vmatpush1.bf16.msra.mxu0 %v470_v41 }
  0x3e   :  { %473 = vmatprep.subr.bf16.mxu0 %v472_v44 }
  0x3f   :  { %531 = vmatpush1.bf16.msra.mxu1 %v530_v54 }
  0x40   :  { %533 = vmatprep.subr.bf16.mxu1 %v532_v55 }
  0x41   :  { %475 = vmatpush1.bf16.msra.mxu0 %v474_v51 }
  0x43   :  { %535 = vmatpush1.bf16.msra.mxu1 %v534_v62 }
  0x44   :  { %151 = vmatmul.mubr.f32.vlgmr.msra.gmra.mrb[0].mxu0 %v14_v58  ;;  %537 = vmatprep.subr.bf16.mxu1 %v536_v63 }
  0x45   :  { %156 = vmatprep.mubr.f32.mxu0 %v17_v61 }
  0x47   :  { %539 = vmatpush1.bf16.msra.mxu1 %v538_v4 }
  0x48   :  { %157 = vmatmul.mubr.f32.gmra.mrb[2].mxu0 %v16_v2 }
  0x49   :  { %162 = vmatprep.mubr.f32.mxu0 %v19_v3 }
  0x4a   :  { %304 = vmatmul.mubr.f32.vlgmr.msra.gmra.mrb[0].mxu1 %v14_v58 }
  0x4b   :  { %309 = vmatprep.mubr.f32.mxu1 %v17_v61 }
  0x4c   :  { %163 = vmatmul.mubr.f32.gmra.mrb[4].mxu0 %v18_v5 }
  0x4d   :  { %168 = vmatprep.mubr.f32.mxu0 %v21_v6 }
  0x4e   :  { %310 = vmatmul.mubr.f32.gmra.mrb[2].mxu1 %v16_v2 }
  0x4f   :  { %315 = vmatprep.mubr.f32.mxu1 %v19_v3 }
  0x50   :  { %169 = vmatmul.mubr.f32.gmra.mrb[6].mxu0 %v20_v7 }
  0x52   :  { %316 = vmatmul.mubr.f32.gmra.mrb[4].mxu1 %v18_v5 }
  0x53   :  { %321 = vmatprep.mubr.f32.mxu1 %v21_v6 }
  0x56   :  { %322 = vmatmul.mubr.f32.gmra.mrb[6].mxu1 %v20_v7 }
 0x117   :  { %v152_v8 = vpop.f32.mrb[0].mxu0 }
 0x118   :  { %v404_v9 = vmul.f32 -1.442695, %v152_v8  ;;  %v154_v10 = vpop.f32.mrb[1].mxu0 }
 0x119   :  { %v405_v11 = vmul.f32 -1.442695, %v154_v10 }
 0x11a   :  { %540 = vpow2.f32 %v404_v9 }
 0x11b   :  { %542 = vpow2.f32 %v405_v11  ;;  %v158_v12 = vpop.f32.mrb[2].mxu0 }
 0x11c   :  { %v406_v13 = vmul.f32 -1.442695, %v158_v12  ;;  %v160_v14 = vpop.f32.mrb[3].mxu0 }
 0x11d   :  { %v407_v15 = vmul.f32 -1.442695, %v160_v14  ;;  %v305_v20 = vpop.f32.mrb[0].mxu1 }
 0x11e   :  { %544 = vpow2.f32 %v406_v13  ;;  %v307_v21 = vpop.f32.mrb[1].mxu1 }
 0x11f   :  { %546 = vpow2.f32 %v407_v15  ;;  %v164_v16 = vpop.f32.mrb[4].mxu0 }
 0x120   :  { %v408_v17 = vmul.f32 -1.442695, %v164_v16  ;;  %v166_v18 = vpop.f32.mrb[5].mxu0 }
 0x121   :  { %v409_v19 = vmul.f32 -1.442695, %v166_v18  ;;  %v311_v29 = vpop.f32.mrb[2].mxu1 }
 0x122   :  { %548 = vpow2.f32 %v408_v17  ;;  %v313_v31 = vpop.f32.mrb[3].mxu1 }
 0x123   :  { %550 = vpow2.f32 %v409_v19  ;;  %v170_v22 = vpop.f32.mrb[6].mxu0 }
 0x124   :  { %v541_v23 = vpop.eup %540  ;;  %v410_v24 = vmul.f32 -1.442695, %v170_v22  ;;  %v172_v25 = vpop.f32.mrb[7].mxu0 }
 0x125   :  { %v543_v26 = vpop.eup %542  ;;  %v352_v27 = vadd.f32 1.0, %v541_v23  ;;  %v411_v28 = vmul.f32 -1.442695, %v172_v25  ;;  %v317_v35 = vpop.f32.mrb[4].mxu1 }
 0x126   :  { %v353_v30 = vadd.f32 1.0, %v543_v26  ;;  %552 = vpow2.f32 %v410_v24  ;;  %v319_v37 = vpop.f32.mrb[5].mxu1 }
 0x127   :  { %554 = vrcp.f32 %v352_v27 }
 0x128   :  { %v545_v32 = vpop.eup %544  ;;  %556 = vrcp.f32 %v353_v30 }
 0x129   :  { %v547_v33 = vpop.eup %546  ;;  %v354_v34 = vadd.f32 1.0, %v545_v32  ;;  %558 = vpow2.f32 %v411_v28  ;;  %v323_v41 = vpop.f32.mrb[6].mxu1 }
 0x12a   :  { %v355_v36 = vadd.f32 1.0, %v547_v33  ;;  %v325_v43 = vpop.f32.mrb[7].mxu1 }
 0x12b   :  { %560 = vrcp.f32 %v354_v34 }
 0x12c   :  { %v549_v38 = vpop.eup %548  ;;  %562 = vrcp.f32 %v355_v36 }
 0x12d   :  { %v551_v39 = vpop.eup %550  ;;  %v356_v40 = vadd.f32 1.0, %v549_v38 }
 0x12e   :  { %v357_v42 = vadd.f32 1.0, %v551_v39 }
 0x12f   :  { %564 = vrcp.f32 %v356_v40 }
 0x130   :  { %v553_v44 = vpop.eup %552  ;;  %566 = vrcp.f32 %v357_v42 }
 0x131   :  { %v555_v45 = vpop.eup %554  ;;  %v358_v46 = vadd.f32 1.0, %v553_v44 }
 0x132   :  { %v557_v47 = vpop.eup %556  ;;  %v376_v48 = vmul.f32 %v555_v45, %v152_v8 }
 0x133   :  { %v559_v49 = vpop.eup %558  ;;  %v377_v50 = vmul.f32 %v557_v47, %v154_v10  ;;  %568 = vrcp.f32 %v358_v46 }
 0x134   :  { %v359_v51 = vadd.f32 1.0, %v559_v49  ;;  %v384_v52 = vmul.f32 %v376_v48, %v305_v20 }
 0x135   :  { %v561_v53 = vpop.eup %560  ;;  %v385_v54 = vmul.f32 %v377_v50, %v307_v21 }
 0x136   :  { %v563_v55 = vpop.eup %562  ;;  %v378_v56 = vmul.f32 %v561_v53, %v158_v12  ;;  %570 = vrcp.f32 %v359_v51  ;;  %392 = vst [vmem:[%s1027_s3] sm:$0xff] %v384_v52 }
 0x137   :  { %v379_v57 = vmul.f32 %v563_v55, %v160_v14  ;;  %393 = vst [vmem:[%s1027_s3 + $0x8] sm:$0xff] %v385_v54 }
 0x138   :  { %v386_v58 = vmul.f32 %v378_v56, %v311_v29 }
 0x139   :  { %v565_v59 = vpop.eup %564  ;;  %v387_v60 = vmul.f32 %v379_v57, %v313_v31 }
 0x13a   :  { %v567_v61 = vpop.eup %566  ;;  %v380_v62 = vmul.f32 %v565_v59, %v164_v16  ;;  %394 = vst [vmem:[%s1027_s3 + $0x10] sm:$0xff] %v386_v58 }
 0x13b   :  { %v381_v63 = vmul.f32 %v567_v61, %v166_v18  ;;  %395 = vst [vmem:[%s1027_s3 + $0x18] sm:$0xff] %v387_v60 }
 0x13c   :  { %v388_v0 = vmul.f32 %v380_v62, %v317_v35 }
 0x13d   :  { %v569_v1 = vpop.eup %568  ;;  %v389_v2 = vmul.f32 %v381_v63, %v319_v37 }
 0x13e   :  { %v382_v3 = vmul.f32 %v569_v1, %v170_v22  ;;  %396 = vst [vmem:[%s1027_s3 + $0x20] sm:$0xff] %v388_v0 }
 0x13f   :  { %397 = vst [vmem:[%s1027_s3 + $0x28] sm:$0xff] %v389_v2 }
 0x140   :  { %v571_v4 = vpop.eup %570  ;;  %v390_v5 = vmul.f32 %v382_v3, %v323_v41 }
 0x141   :  { %v383_v6 = vmul.f32 %v571_v4, %v172_v25 }
 0x142   :  { %398 = vst [vmem:[%s1027_s3 + $0x30] sm:$0xff] %v390_v5 }
 0x143   :  { %v391_v7 = vmul.f32 %v383_v6, %v325_v43 }
 0x145   :  { %399 = vst [vmem:[%s1027_s3 + $0x38] sm:$0xff] %v391_v7 }

// kernel: deltanet_block_forward.15
= control target key start
LH: loop header
LB: loop body
LE: loop exit
PB: predicated region body
PF: predicated region fallthrough
CT: control target
= control target key end

     0   :  { %s459_s0 = inlined_call_operand.vmem [shape: f32[32,256], index: 0, kind: input, shape index: {}]   ;;  %s460_s1 = inlined_call_operand.vmem [shape: f32[256,32], index: 1, kind: input, shape index: {}]   ;;  %s461_s2 = inlined_call_operand.vmem [shape: f32[32,32], index: 2, kind: input, shape index: {}]   ;;  %s462_s3 = inlined_call_operand.hbm [shape: f32[32,32], index: 3, kind: output, shape index: {}]  }
   0x1   :  { %v43_v0 = vld [vmem:[%s460_s1 + $0x80] sm:$0xff]  ;;  %v44_v1 = vld [vmem:[%s460_s1 + $0x88] sm:$0xff]  ;;  %v45_v5 = vld [vmem:[%s460_s1 + $0x90] sm:$0xff] }
   0x2   :  { %v27_v2 = vld [vmem:[%s460_s1] sm:$0xff]  ;;  %v213_v3 = vpack.c.bf16 %v44_v1, %v43_v0  ;;  %v28_v4 = vld [vmem:[%s460_s1 + $0x8] sm:$0xff]  ;;  %v46_v6 = vld [vmem:[%s460_s1 + $0x98] sm:$0xff] }
   0x3   :  { %v215_v7 = vpack.c.bf16 %v28_v4, %v27_v2  ;;  %v217_v8 = vpack.c.bf16 %v46_v6, %v45_v5  ;;  %v29_v9 = vld [vmem:[%s460_s1 + $0x10] sm:$0xff]  ;;  %v30_v10 = vld [vmem:[%s460_s1 + $0x18] sm:$0xff]  ;;  %v47_v11 = vld [vmem:[%s460_s1 + $0xa0] sm:$0xff] }
   0x4   :  { %214 = vmatprep.subr.bf16.mxu0 %v213_v3  ;;  %245 = vmatprep.subr.bf16.mxu1 %v213_v3  ;;  %v48_v12 = vld [vmem:[%s460_s1 + $0xa8] sm:$0xff]  ;;  %v219_v13 = vpack.c.bf16 %v30_v10, %v29_v9  ;;  %v31_v15 = vld [vmem:[%s460_s1 + $0x20] sm:$0xff]  ;;  %v49_v17 = vld [vmem:[%s460_s1 + $0xb0] sm:$0xff] }
   0x5   :  { %216 = vmatpush3.bf16.msra.mxu0 %v215_v7  ;;  %253 = vmatpush3.bf16.msra.mxu1 %v215_v7  ;;  %v221_v14 = vpack.c.bf16 %v48_v12, %v47_v11  ;;  %v32_v16 = vld [vmem:[%s460_s1 + $0x28] sm:$0xff]  ;;  %v50_v18 = vld [vmem:[%s460_s1 + $0xb8] sm:$0xff]  ;;  %v33_v21 = vld [vmem:[%s460_s1 + $0x30] sm:$0xff] }
   0x6   :  { %218 = vmatprep.subr.bf16.mxu0 %v217_v8  ;;  %246 = vmatprep.subr.bf16.mxu1 %v217_v8  ;;  %v223_v19 = vpack.c.bf16 %v32_v16, %v31_v15  ;;  %v225_v20 = vpack.c.bf16 %v50_v18, %v49_v17  ;;  %v34_v22 = vld [vmem:[%s460_s1 + $0x38] sm:$0xff]  ;;  %v51_v23 = vld [vmem:[%s460_s1 + $0xc0] sm:$0xff]  ;;  %v52_v24 = vld [vmem:[%s460_s1 + $0xc8] sm:$0xff] }
   0x7   :  { %v20_v25 = vld [vmem:[%s459_s0 + $0x8] sm:$0xff]  ;;  %v227_v27 = vpack.c.bf16 %v34_v22, %v33_v21  ;;  %v229_v28 = vpack.c.bf16 %v52_v24, %v51_v23  ;;  %v35_v29 = vld [vmem:[%s460_s1 + $0x40] sm:$0xff] }
   0x8   :  { %123 = vmatprep.mubr.f32.mxu0 %v20_v25  ;;  %v24_v26 = vld [vmem:[%s459_s0 + $0x28] sm:$0xff] }
   0x9   :  { %220 = vmatpush3.bf16.msra.mxu0 %v219_v13  ;;  %254 = vmatpush3.bf16.msra.mxu1 %v219_v13  ;;  %v36_v30 = vld [vmem:[%s460_s1 + $0x48] sm:$0xff] }
   0xa   :  { %222 = vmatprep.subr.bf16.mxu0 %v221_v14  ;;  %247 = vmatprep.subr.bf16.mxu1 %v221_v14 }
   0xd   :  { %224 = vmatpush3.bf16.msra.mxu0 %v223_v19  ;;  %255 = vmatpush3.bf16.msra.mxu1 %v223_v19 }
   0xe   :  { %226 = vmatprep.subr.bf16.mxu0 %v225_v20  ;;  %248 = vmatprep.subr.bf16.mxu1 %v225_v20 }
   0xf   :  { %8 = vsyncpa [#allocation3], 0  ;;  %v53_v31 = vld [vmem:[%s460_s1 + $0xd0] sm:$0xff]  ;;  %v54_v32 = vld [vmem:[%s460_s1 + $0xd8] sm:$0xff]  ;;  %133 = vmatprep.mubr.f32.mxu1 %v24_v26  ;;  %v231_v33 = vpack.c.bf16 %v36_v30, %v35_v29  ;;  %vm148_vm0 = vcmask 261120  }
  0x10   :  { %v233_v34 = vpack.c.bf16 %v54_v32, %v53_v31  ;;  %v37_v35 = vld [vmem:[%s460_s1 + $0x50] sm:$0xff]  ;;  %v38_v36 = vld [vmem:[%s460_s1 + $0x58] sm:$0xff]  ;;  %v55_v37 = vld [vmem:[%s460_s1 + $0xe0] sm:$0xff] }
  0x11   :  { %228 = vmatpush3.bf16.msra.mxu0 %v227_v27  ;;  %256 = vmatpush3.bf16.msra.mxu1 %v227_v27  ;;  %v56_v38 = vld [vmem:[%s460_s1 + $0xe8] sm:$0xff]  ;;  %v235_v39 = vpack.c.bf16 %v38_v36, %v37_v35  ;;  %v39_v41 = vld [vmem:[%s460_s1 + $0x60] sm:$0xff]  ;;  %v57_v43 = vld [vmem:[%s460_s1 + $0xf0] sm:$0xff] }
  0x12   :  { %230 = vmatprep.subr.bf16.mxu0 %v229_v28  ;;  %249 = vmatprep.subr.bf16.mxu1 %v229_v28  ;;  %v237_v40 = vpack.c.bf16 %v56_v38, %v55_v37  ;;  %v40_v42 = vld [vmem:[%s460_s1 + $0x68] sm:$0xff]  ;;  %v58_v44 = vld [vmem:[%s460_s1 + $0xf8] sm:$0xff]  ;;  %v41_v47 = vld [vmem:[%s460_s1 + $0x70] sm:$0xff] }
  0x13   :  { %v239_v45 = vpack.c.bf16 %v40_v42, %v39_v41  ;;  %v241_v46 = vpack.c.bf16 %v58_v44, %v57_v43  ;;  %v42_v48 = vld [vmem:[%s460_s1 + $0x78] sm:$0xff]  ;;  %v19_v50 = vld [vmem:[%s459_s0] sm:$0xff]  ;;  %v21_v54 = vld [vmem:[%s459_s0 + $0x10] sm:$0xff] }
  0x14   :  { %v243_v49 = vpack.c.bf16 %v42_v48, %v41_v47  ;;  %v23_v51 = vld [vmem:[%s459_s0 + $0x20] sm:$0xff]  ;;  %v22_v52 = vld [vmem:[%s459_s0 + $0x18] sm:$0xff]  ;;  %v25_v55 = vld [vmem:[%s459_s0 + $0x30] sm:$0xff] }
  0x15   :  { %232 = vmatpush3.bf16.msra.mxu0 %v231_v33  ;;  %257 = vmatpush3.bf16.msra.mxu1 %v231_v33  ;;  %v26_v53 = vld [vmem:[%s459_s0 + $0x38] sm:$0xff]  ;;  %v15_v58 = vld [vmem:[%s461_s2] sm:$0xff]  ;;  %v17_v60 = vld [vmem:[%s461_s2 + $0x10] sm:$0xff]  ;;  %s288_s0 = smov [#allocation2]  }
  0x16   :  { %234 = vmatprep.subr.bf16.mxu0 %v233_v34  ;;  %250 = vmatprep.subr.bf16.mxu1 %v233_v34  ;;  %s158_s14 = sshll.u32 %s288_s0, 4  ;;  %v16_v4 = vld [vmem:[%s461_s2 + $0x8] sm:$0xff]  ;;  %v18_v6 = vld [vmem:[%s461_s2 + $0x18] sm:$0xff]  ;;  %s159_s14 = int_to_ptr.vmem [resolvable:$true] %s158_s14 }
  0x17   :  { %s264_s19 = scalar_lea.vmem %s159_s14, 512  ;;  %p269_p1 = scmp.lt.s32.totalorder %s159_s14, %s159_s14 }
  0x18   :  { %p265_p0 = scmp.ne.s32.totalorder %s159_s14, %s264_s19  ;;  %p270_p2 = scmp.lt.s32.totalorder %s264_s19, %s264_s19 }
  0x19   :  { %236 = vmatpush3.bf16.msra.mxu0 %v235_v39  ;;  %258 = vmatpush3.bf16.msra.mxu1 %v235_v39 }
  0x1a   :  { %238 = vmatprep.subr.bf16.mxu0 %v237_v40  ;;  %251 = vmatprep.subr.bf16.mxu1 %v237_v40  ;;  %p271_p3 = por %p270_p2, %p269_p1 }
  0x1c   :  { %p272_p4 = pnand %p271_p3, %p265_p0 }
  0x1d   :  { %240 = vmatpush3.bf16.msra.mxu0 %v239_v45  ;;  %259 = vmatpush3.bf16.msra.mxu1 %v239_v45 }
  0x1e   :  { %242 = vmatprep.subr.bf16.mxu0 %v241_v46  ;;  %252 = vmatprep.subr.bf16.mxu1 %v241_v46 }
  0x21   :  { %244 = vmatpush3.bf16.msra.mxu0 %v243_v49  ;;  %260 = vmatpush3.bf16.msra.mxu1 %v243_v49 }
  0x24   :  { %124 = vmatmul.mubr.f32.vlgmr.msra.gmra.mrb[0].mxu0 %v19_v50  ;;  %134 = vmatmul.mubr.f32.vlgmr.msra.gmra.mrb[0].mxu1 %v23_v51 }
  0x25   :  { %128 = vmatprep.mubr.f32.mxu0 %v22_v52  ;;  %138 = vmatprep.mubr.f32.mxu1 %v26_v53 }
  0x28   :  { %129 = vmatmul.mubr.f32.gmra.mrb[2].mxu0 %v21_v54  ;;  %139 = vmatmul.mubr.f32.gmra.mrb[2].mxu1 %v25_v55 }
  0xf7   :  { %v201_v56 = vpop.f32.mrb[0].mxu0  ;;  %v207_v57 = vpop.f32.mrb[0].mxu1 }
  0xf8   :  { %v202_v59 = vpop.f32.mrb[1].mxu0  ;;  %v208_v61 = vpop.f32.mrb[1].mxu1 }
  0xf9   :  { %v203_v62 = vadd.f32 %v202_v59, %v201_v56  ;;  %v209_v63 = vadd.f32 %v208_v61, %v207_v57 }
  0xfb   :  { %v144_v0 = vadd.f32 %v203_v62, %v15_v58  ;;  %v146_v1 = vadd.f32 %v209_v63, %v17_v60  ;;  %v204_v2 = vpop.f32.mrb[2].mxu0  ;;  %v210_v3 = vpop.f32.mrb[2].mxu1 }
  0xfc   :  { %v205_v5 = vpop.f32.mrb[3].mxu0  ;;  %v211_v7 = vpop.f32.mrb[3].mxu1 }
  0xfd   :  { %149 = vst.msk [vmem:[#allocation2] sm:$0xff] %vm148_vm0, %v144_v0  ;;  %151 = vst.msk [vmem:[#allocation2 + $0x10] sm:$0xff] %vm148_vm0, %v146_v1  ;;  %v206_v8 = vadd.f32 %v205_v5, %v204_v2  ;;  %v212_v9 = vadd.f32 %v211_v7, %v210_v3 }
  0xff   :  { %v145_v10 = vadd.f32 %v206_v8, %v16_v4  ;;  %v147_v11 = vadd.f32 %v212_v9, %v18_v6 }
 0x101   :  { %150 = vst.msk [vmem:[#allocation2 + $0x8] sm:$0xff] %vm148_vm0, %v145_v10  ;;  %152 = vst.msk [vmem:[#allocation2 + $0x18] sm:$0xff] %vm148_vm0, %v147_v11 }
 0x102   :  { %275 = shalt.err (!%p272_p4)
}
 0x103   :  { %s276_s21 = scalar_lea.hbm %s462_s3, 512 }
 0x104   :  { %p277_p5 = scmp.ne.s32.totalorder %s462_s3, %s276_s21  ;;  %p280_p6 = scmp.lt.u32.totalorder %s276_s21, %s462_s3 }
 0x106   :  { %p282_p7 = pnand %p280_p6, %p277_p5 }
 0x108   :  { %285 = shalt.err (!%p282_p7)
}
 0x109   :  { %s289_s26 = smov 128   ;;  %s290_s27 = smov 8  }
 0x10a   :  { %164 = dma.vmem_to_hbm [thread:$0]  %s159_s14, 512, %s462_s3, [#allocation3], %s289_s26, %s289_s26, %s290_s27  }
 0x10b   :  { %286 = dma.done.wait [#allocation3], 512  }
 0x10c   :  { %287 = vsyncadd [#allocation3], 4294966784 }
 0x10d   :  { %168 = vsyncpa [#allocation3], 1 }

// kernel: deltanet_block_forward.11
= control target key start
LH: loop header
LB: loop body
LE: loop exit
PB: predicated region body
PF: predicated region fallthrough
CT: control target
= control target key end

     0   :  { %7 = vsyncpa [#allocation3], 0  ;;  %s817_s0 = inlined_call_operand.vmem [shape: f32[2,4,16,8], index: 0, kind: input, shape index: {}]   ;;  %s818_s1 = inlined_call_operand.vmem [shape: f32[2,4,16,8], index: 1, kind: input, shape index: {}]   ;;  %s819_s2 = inlined_call_operand.hbm [shape: f32[2,4,8,8], index: 2, kind: output, shape index: {}]  }
   0x1   :  { %9 = vsyncpa [#allocation3 + $0x1], 0  ;;  %s674_s9 = smov 0   ;;  %s676_s10 = smov 0  }
   0x2   :  { %s678_s11 = smov 0   ;;  %s680_s12 = smov 0  }
   0x3   :  { %s682_s13 = smov 0   ;;  %s684_s14 = smov 0  }
   0x4   :  { %s686_s15 = smov 0   ;;  %s688_s16 = smov 0  }
   0x5 LB: > { %s450_s17 = sadd.s32 4294967295, %s653_s16   ;;  %s451_s18 = sadd.s32 4294967294, %s653_s16   ;;  %s653_s16 = sphi %s688_s16, %s15_s16   ;;  %s649_s15 = sphi %s686_s15, %s828_s15   ;;  %s645_s14 = sphi %s684_s14, %s827_s14   ;;  %s641_s13 = sphi %s682_s13, %s826_s13   ;;  %s637_s12 = sphi %s680_s12, %s825_s12   ;;  %s633_s11 = sphi %s678_s11, %s824_s11   ;;  %s629_s10 = sphi %s676_s10, %s823_s10   ;;  %s625_s9 = sphi %s674_s9, %s822_s9  }
   0x6   : > { %s24_s19 = sadd.s32 1, %s645_s14  ;;  %s27_s20 = sadd.s32 1, %s649_s15 }
   0x7   : > { %p25_p0 = scmp.ge.s32.totalorder %s24_s19, 4  ;;  %p102_p1 = scmp.ne.s32.totalorder %s633_s11, %s629_s10 }
   0x8   : > { %p103_p2 = scmp.eq.s32.totalorder %s450_s17, 7  ;;  %p108_p5 = scmp.ne.s32.totalorder %s629_s10, %s625_s9 }
   0x9   : > { %s830_s19 = smov (%p25_p0, %s24_s19), 0  ;;  %s832_s20 = smov (!%p25_p0, %s27_s20), %s649_s15 }
   0xa   : > { %s88_s21 = ssub.s32 %s645_s14, %s830_s19  ;;  %p725_p3 = por %p103_p2, %p102_p1 }
   0xb   : > { %p29_p4 = scmp.ge.s32.totalorder %s832_s20, 2  ;;  %p109_p6 = scmp.eq.s32.totalorder %s451_s18, 7 }
   0xc   : > { %p454_p7 = scmp.ge.s32.totalorder %s653_s16, 1  ;;  %p151_p9 = scmp.lt.s32.totalorder %s653_s16, 9 }
   0xd   : > { %s834_s20 = smov (%p29_p4, %s832_s20), 0  ;;  %p734_p8 = por %p109_p6, %p108_p5 }
   0xe   : > { %s87_s24 = ssub.s32 %s649_s15, %s834_s20  ;;  %s92_s25 = sadd.s32 1, %s633_s11 }
   0xf   : > { %s89_s26 = sor.u32 %s88_s21, %s87_s24  ;;  %p152_p10 = pnand %p454_p7, %p151_p9 }
  0x10   : > { %p90_p11 = scmp.eq.s32.totalorder %s89_s26, 0  ;;  %p186_p12 = scmp.lt.s32.totalorder (!%p152_p10), %s641_s13, 1  ;;  %vm208_vm0 = vcmask (!%p152_p10), 64512   ;;  %v655_v6 = vmov (!%p152_p10), 0.0|0.0   ;;  %vm656_vm1 = vmmov (!%p152_p10), 0   ;;  %v657_v9 = vmov (!%p152_p10), 0.0  }
  0x11   : > { %155 = sbr.rel (%p152_p10) target bundleno = 546 (0x222), region = 28  ;;  %p188_p13 = scmp.lt.s32.totalorder (!%p152_p10), %s637_s12, 3  ;;  %478 = vmatprep.subr.bf16.mxu0 (!%p152_p10), %v655_v6  ;;  %475 = vmatprep.mubr.msk.f32.mxu0 (!%p152_p10), %vm656_vm1, %v657_v9  ;;  %vm257_vm4 = vcmask (!%p152_p10), 130048  }
  0x12   : > { %s743_s27 = scalar_select %p90_p11, %s633_s11, %s92_s25  }
  0x13   : > { %s183_s24 = sand.u32 (!%p152_p10), 1, %s629_s10   ;;  %s464_s26 = sshll.u32 (!%p152_p10), %s641_s13, 2 }
  0x14   : > { %s455_s25 = sshll.u32 (!%p152_p10), %s183_s24, 3  ;;  %s333_s7 = scalar_lea.sflag (!%p152_p10), [#allocation3], %s183_s24 }
  0x18   : > { %s187_s28 = scalar_select %p186_p12, %s641_s13, 1 }
  0x19   : > { %s189_s29 = scalar_select %p188_p13, %s637_s12, 3 }
  0x1a   : > { %s457_s30 = sshll.u32 %s187_s28, 3  ;;  %s344_s28 = sadd.s32 %s637_s12, %s464_s26 }
  0x1b   : > { %s456_s3 = sshll.u32 %s189_s29, 1  ;;  %s465_s29 = sshll.u32 %s344_s28, 7 }
  0x1c   : > { %s192_s4 = sadd.s32 %s457_s30, %s456_s3  ;;  %s185_s30 = scalar_lea.vmem [#allocation2], %s455_s25 }
  0x1d   : > { %s458_s5 = sshll.u32 %s192_s4, 3  ;;  %s348_s3 = sshll.u32 %s185_s30, 4  ;;  %s765_s3 = int_to_ptr.vmem [resolvable:$true] %s348_s3 }
  0x1e   : > { %s194_s8 = scalar_lea.vmem %s817_s0, %s458_s5  ;;  %s203_s21 = scalar_lea.vmem %s818_s1, %s458_s5 }
  0x1f   : > { %v204_v0 = vld [vmem:[%s194_s8] sm:$0xff]  ;;  %v205_v1 = vld [vmem:[%s194_s8 + $0x8] sm:$0xff]  ;;  %s763_s6 = scalar_lea.hbm %s819_s2, %s465_s29  ;;  %s559_s13 = scalar_lea.vmem %s765_s3, 128 }
  0x20   : > { %v206_v2 = vmul.f32 %v204_v0, %v204_v0  ;;  %v207_v3 = vmul.f32 %v205_v1, %v205_v1  ;;  %v223_v7 = vld [vmem:[%s203_s21] sm:$0xff]  ;;  %v224_v8 = vld [vmem:[%s203_s21 + $0x8] sm:$0xff]  ;;  %p560_p0 = scmp.ne.s32.totalorder %s765_s3, %s559_s13  ;;  %s658_s12 = smov [#allocation2]  }
  0x21   : > { %v479_v10 = vpack.c.bf16 %v224_v8, %v223_v7  ;;  %s563_s8 = sshll.u32 %s658_s12, 4  ;;  %s564_s8 = int_to_ptr.vmem [resolvable:$false] %s563_s8 }
  0x22   : > { %v209_v4 = vsel %vm208_vm0, %v206_v2, 0.0  ;;  %v212_v5 = vsel %vm208_vm0, %v207_v3, 0.0  ;;  %p561_p1 = pnand %p560_p0, %p725_p3  ;;  %s565_s17 = scalar_lea.vmem %s564_s8, 256 }
  0x23   : > { %210 = vadd.xlane.f32.xlu0 %v209_v4  ;;  %480 = vmatpush3.bf16.msra.mxu0 %v479_v10  ;;  %p566_p4 = scmp.lt.s32.totalorder %s765_s3, %s564_s8  ;;  %p567_p5 = scmp.lt.s32.totalorder %s565_s17, %s559_s13 }
  0x24   : > { %p562_p2 = pneg %p561_p1 }
  0x25   : > { %p568_p6 = por %p567_p5, %p566_p4 }
  0x27   : > { %213 = vadd.xlane.f32.xlu0 %v212_v5  ;;  %p569_p7 = pnand %p568_p6, %p562_p2 }
  0xb0   : > { %v211_v11 = vpop.xlane.xlu0 %210 }
  0xb1   : > { %555 = vrsqrt.f32 %v211_v11  ;;  %vm215_vm2 = vcmp.gt.f32.partialorder %v211_v11, 0.0 }
  0xb4   : > { %v214_v12 = vpop.xlane.xlu0 %213 }
  0xb5   : > { %557 = vrsqrt.f32 %v214_v12  ;;  %vm216_vm3 = vcmp.gt.f32.partialorder %v214_v12, 0.0 }
  0xbb   : > { %v556_v13 = vpop.eup %555 }
  0xbc   : > { %v219_v14 = vsel %vm215_vm2, %v556_v13, 0.0 }
  0xbd   : > { %v221_v15 = vmul.f32 %v219_v14, %v204_v0 }
  0xbf   : > { %v558_v16 = vpop.eup %557  ;;  %225 = vxpose.xlu1.b32.start [1/2] (short) (narrow) %v221_v15, 8 }
  0xc0   : > { %v220_v17 = vsel %vm216_vm3, %v558_v16, 0.0 }
  0xc1   : > { %v222_v18 = vmul.f32 %v220_v17, %v205_v1 }
  0xc3   : > { %226 = vxpose.xlu1.b32.end [2/2] (short) (narrow) %v222_v18, 8 }
 0x13f   : > { %v241_v19 = vpop.trf.xlu1 }
 0x140   : > { %476 = vmatmul.mubr.msk.f32.vlgmr.msra.gmra.mrb[0].mxu0 %vm257_vm4, %v241_v19 }
 0x213   : > { %v327_v20 = vpop.f32.mrb[0].mxu0 }
 0x214   : > { %331 = vst.msk [vmem:[%s185_s30] sm:$0xff] %vm208_vm0, %v327_v20  ;;  %v477_v21 = vpop.f32.mrb[1].mxu0 }
 0x215   : > { %572 = shalt.err (!%p569_p7)
}
 0x216   : > { %s573_s18 = scalar_lea.hbm %s763_s6, 128  ;;  %s577_s25 = scalar_lea.hbm %s819_s2, 1024 }
 0x217   : > { %p574_p9 = scmp.ne.s32.totalorder %s763_s6, %s573_s18  ;;  %p578_p12 = scmp.lt.u32.totalorder %s763_s6, %s819_s2 }
 0x218   : > { %p579_p13 = scmp.lt.u32.totalorder %s577_s25, %s573_s18  ;;  %p581_p1 = scmp.lt.u32.totalorder %s573_s18, %s763_s6 }
 0x219   : > { %p575_p10 = pnand %p574_p9, %p725_p3 }
 0x21a   : > { %p580_p0 = por %p579_p13, %p578_p12 }
 0x21b   : > { %p576_p11 = pneg %p575_p10 }
 0x21c   : > { %p582_p2 = por %p581_p1, %p580_p0 }
 0x21e   : > { %p583_p4 = pnand %p582_p2, %p576_p11 }
 0x220   : > { %586 = shalt.err (!%p583_p4)
}
 0x221   : > { %481 = dma.vmem_to_hbm [thread:$0]  (%p725_p3), %s765_s3, 128, %s763_s6, %s333_s7  }
 0x222 PF: > { %p487_p5 = scmp.ge.s32.totalorder %s653_s16, 2  ;;  %s360_s29 = sand.u32 1, %s625_s9  }
 0x223   : > { %s361_s30 = scalar_lea.sflag [#allocation3], %s360_s29 }
 0x224   : > { %p484_p6 = pnand %p487_p5, %p734_p8 }
 0x226   : > { %620 = dma.done.wait (!%p484_p6), %s361_s30, 128  }
 0x227   : > { %622 = vsyncadd (!%p484_p6), %s361_s30, 4294967168  ;;  %s15_s16 = sadd.s32 1, %s653_s16   ;;  %s822_s9 = smov %s629_s10 }
 0x228   : > { %p12_p7 = scmp.ge.s32.totalorder %s15_s16, 10   ;;  %s823_s10 = smov %s633_s11 }
 0x229   : > { %s824_s11 = smov %s743_s27  ;;  %s825_s12 = smov %s645_s14 }
 0x22a   : > { %s826_s13 = smov %s649_s15  ;;  %s827_s14 = smov %s830_s19 }
 0x22b   : > { %s828_s15 = smov %s834_s20  ;;  %14 = sbr.rel (!%p12_p7) target bundleno = 5 (0x5), region = 66 }
 0x232   :  { %366 = vsyncpa [#allocation3], 1 }
 0x233   :  { %368 = vsyncpa [#allocation3 + $0x1], 1 }

</bundles_post_ra>
